<compile_context>
chip_gen: v6e
topology: v6e:2x2x1
jax: 0.10.0
libtpu: 0.0.40
codegen_flags: <defaults>
</compile_context>

<pallas_src>
import functools

import jax
import jax.numpy as jnp
from jax.experimental import pallas as pl
from jax.experimental.pallas import tpu as pltpu

_LANE = 128
_VMEM_LIMIT = 48 * 1024 * 1024  # fits scoped VMEM on v5e/v6e and v7x's 64 MiB


def _round_up(x, m):
    return (x + m - 1) // m * m


# ----------------------------- Pallas kernel -------------------------------

def deeper_gcn_kernel(x_ref, enc_w_ref, enc_b_ref,
                      scale_ref, shift_ref, g_ref, m_ref,
                      w_ref, b_ref,
                      fin_scale_ref, fin_shift_ref, pred_w_ref, pred_b_ref,
                      o_ref, h_ref, cat_ref, *, t, eps, hidden):
    """Fused encoder + all 'res+' GEN layers + prediction head.

    Grid axis 0 = layer ("arbitrary").  h_ref is the VMEM-resident node state,
    cat_ref packs [expv | expv*msg] for the single fused scatter matmul, and
    o_ref (the only HBM output) is written once on the last layer.
    """
    l = pl.program_id(0)
    last = pl.num_programs(0) - 1

    # -- layer 0 prologue: node feature encoder (one-shot, f32 for precision) --
    @pl.when(l == 0)
    def _():
        h_ref[...] = (
            jnp.dot(x_ref[...], enc_w_ref[...],
                    preferred_element_type=jnp.float32)
            + enc_b_ref[...]
        )

    h = h_ref[...]                                   # (N, H) f32, resident
    flag = jnp.minimum(l, 1).astype(jnp.float32)     # 0.0 for layer 0, else 1.0

    # prelude: BN(eval, folded) -> ReLU -> dropout(identity); gated off at l==0
    pre = jnp.maximum(h * scale_ref[0] + shift_ref[0], 0.0)
    z = flag * pre + (1.0 - flag) * h                # (N, H) f32

    # gather x_j = z[src] as one-hot matmul:  G(E,N) @ z(N,H) -> (E,H)
    xj = jnp.dot(g_ref[...], z.astype(jnp.bfloat16),
                 preferred_element_type=jnp.float32)
    msg = jnp.maximum(xj, 0.0) + eps                 # msg_encoder(ReLU) + eps
    logits = msg * t
    # per-feature global max subtraction (softmax-invariant, keeps exp stable)
    gmax = jnp.max(logits, axis=0, keepdims=True)    # (1, H)
    expv = jnp.exp(logits - gmax)                    # (E, H) f32

    # fused scatter: one (N,E) @ (E,2H) matmul gives [denom | numer]
    cat_ref[:, :hidden] = expv.astype(jnp.bfloat16)
    cat_ref[:, hidden:] = (expv * msg).astype(jnp.bfloat16)
    sc = jnp.dot(m_ref[...], cat_ref[...], preferred_element_type=jnp.float32)
    denom = sc[:, :hidden]                           # (N, H) f32
    numer = sc[:, hidden:]                           # (N, H) f32
    # isolated / padded nodes: numer == 0 exactly -> agg == 0
    agg = numer * pl.reciprocal(jnp.maximum(denom, 1e-16), approx=True)

    hp = (z + agg).astype(jnp.bfloat16)              # x + aggregated messages
    out = jnp.dot(hp, w_ref[0], preferred_element_type=jnp.float32) + b_ref[0]

    h_new = out + flag * h                           # residual only for l >= 1
    h_ref[...] = h_new

    # -- last layer epilogue: BN->ReLU->Linear->log_softmax (tasks padded) --
    @pl.when(l == last)
    def _():
        hf = jnp.maximum(h_new * fin_scale_ref[...] + fin_shift_ref[...], 0.0)
        lg = (jnp.dot(hf, pred_w_ref[...], preferred_element_type=jnp.float32)
              + pred_b_ref[...])
        mx = jnp.max(lg, axis=-1, keepdims=True)
        s = lg - mx
        lse = jnp.log(jnp.sum(jnp.exp(s), axis=-1, keepdims=True))
        o_ref[...] = s - lse


# ------------------------------ wrapper ------------------------------------

def pallas_deeper_gcn(x_p, enc_w, enc_b, prelude_scale, prelude_shift, g, m,
                      gcn_w, gcn_b, fin_scale, fin_shift, pred_w, pred_b,
                      *, t=0.1, eps=1e-7):
    num_layers, _, hidden = gcn_b.shape
    n_pad, c_pad = x_p.shape
    e_pad = g.shape[0]
    t_pad = pred_w.shape[1]

    kern = functools.partial(deeper_gcn_kernel, t=t, eps=eps, hidden=hidden)
    grid_spec = pltpu.PrefetchScalarGridSpec(
        num_scalar_prefetch=0,
        grid=(num_layers,),
        in_specs=[
            pl.BlockSpec((n_pad, c_pad), lambda l: (0, 0)),          # x (once)
            pl.BlockSpec((c_pad, hidden), lambda l: (0, 0)),         # enc_w
            pl.BlockSpec((1, hidden), lambda l: (0, 0)),             # enc_b
            pl.BlockSpec((1, 1, hidden), lambda l: (l, 0, 0)),       # BN scale_l
            pl.BlockSpec((1, 1, hidden), lambda l: (l, 0, 0)),       # BN shift_l
            pl.BlockSpec((e_pad, n_pad), lambda l: (0, 0)),          # G (resident)
            pl.BlockSpec((n_pad, e_pad), lambda l: (0, 0)),          # M (resident)
            pl.BlockSpec((1, hidden, hidden), lambda l: (l, 0, 0)),  # W_l (bf16)
            pl.BlockSpec((1, 1, hidden), lambda l: (l, 0, 0)),       # b_l
            pl.BlockSpec((1, hidden), lambda l: (0, 0)),             # final BN scale
            pl.BlockSpec((1, hidden), lambda l: (0, 0)),             # final BN shift
            pl.BlockSpec((hidden, t_pad), lambda l: (0, 0)),         # pred_w
            pl.BlockSpec((1, t_pad), lambda l: (0, 0)),              # pred_b
        ],
        out_specs=pl.BlockSpec((n_pad, t_pad), lambda l: (0, 0)),    # written at l==L-1
        scratch_shapes=[
            pltpu.VMEM((n_pad, hidden), jnp.float32),       # resident node state h
            pltpu.VMEM((e_pad, 2 * hidden), jnp.bfloat16),  # [expv | expv*msg]
        ],
    )
    return pl.pallas_call(
        kern,
        out_shape=jax.ShapeDtypeStruct((n_pad, t_pad), jnp.float32),
        grid_spec=grid_spec,
        compiler_params=pltpu.CompilerParams(
            dimension_semantics=("arbitrary",),
            vmem_limit_bytes=_VMEM_LIMIT),
    )(x_p, enc_w, enc_b, prelude_scale, prelude_shift, g, m,
      gcn_w, gcn_b, fin_scale, fin_shift, pred_w, pred_b)


# -------------------------- parameter construction -------------------------

def init_params(key, in_channels, hidden_channels, num_tasks, num_layers):
    params = {}
    k = key

    def nrm(k, shape, scale=0.1):
        return jax.random.normal(k, shape, dtype=jnp.float32) * scale

    k, k1, k2 = jax.random.split(k, 3)
    params["enc_w"] = nrm(k1, (in_channels, hidden_channels))
    params["enc_b"] = nrm(k2, (1, hidden_channels), 0.01)

    params["gcn_w"] = []
    params["gcn_b"] = []
    params["bn_scale"] = []
    params["bn_shift"] = []
    bn_eps = 1e-5
    for _ in range(num_layers):
        k, k1, k2 = jax.random.split(k, 3)
        params["gcn_w"].append(nrm(k1, (hidden_channels, hidden_channels)))
        params["gcn_b"].append(nrm(k2, (1, hidden_channels), 0.01))
        # BatchNorm1d eval with default running stats (mean=0, var=1, g=1, b=0)
        scale = jnp.full((1, hidden_channels), 1.0 / jnp.sqrt(1.0 + bn_eps),
                         dtype=jnp.float32)
        shift = jnp.zeros((1, hidden_channels), dtype=jnp.float32)
        params["bn_scale"].append(scale)
        params["bn_shift"].append(shift)

    k, k1, k2 = jax.random.split(k, 3)
    params["pred_w"] = nrm(k1, (hidden_channels, num_tasks))
    params["pred_b"] = nrm(k2, (1, num_tasks), 0.01)
    return params


def build_graph_mats(edge_index, num_nodes, n_pad, e_pad):
    """G (E_pad, N_pad) = one_hot(src), M (N_pad, E_pad) = one_hot(dst)^T, bf16.

    Padded edges/nodes get all-zero rows & columns, so they never contribute to
    (or gather from) any real node."""
    src, dst = edge_index[0], edge_index[1]
    num_edges = src.shape[0]
    g = jax.nn.one_hot(src, num_nodes, dtype=jnp.float32)        # (E, N)
    m = jax.nn.one_hot(dst, num_nodes, dtype=jnp.float32).T      # (N, E)
    g = jnp.pad(g, ((0, e_pad - num_edges), (0, n_pad - num_nodes)))
    m = jnp.pad(m, ((0, n_pad - num_nodes), (0, e_pad - num_edges)))
    return g.astype(jnp.bfloat16), m.astype(jnp.bfloat16)


# ------------------------------- forward -----------------------------------

def deeper_gcn_forward(x, edge_index, params, *, num_layers, t=0.1):
    num_nodes, in_channels = x.shape
    hidden = params["enc_w"].shape[1]
    num_tasks = params["pred_w"].shape[1]
    num_edges = edge_index.shape[1]

    n_pad = _round_up(num_nodes, _LANE)
    e_pad = _round_up(num_edges, _LANE)
    c_pad = _round_up(in_channels, _LANE)
    t_pad = _round_up(num_tasks, _LANE)
    assert hidden % _LANE == 0, "hidden_channels must be a multiple of 128"

    g, m = build_graph_mats(edge_index, num_nodes, n_pad, e_pad)

    # node feature encoder operands (pad the contraction dim with zeros)
    x_p = jnp.pad(x, ((0, n_pad - num_nodes), (0, c_pad - in_channels)))
    enc_w = jnp.pad(params["enc_w"], ((0, c_pad - in_channels), (0, 0)))

    # stacked per-layer params.  Prelude (BN->ReLU) of layer l uses norms[l-1];
    # layer 0 has no prelude, so slot 0 holds a dummy that is gated off in-kernel.
    prelude_scale = jnp.stack([params["bn_scale"][0]]
                              + params["bn_scale"][:num_layers - 1])   # (L,1,H)
    prelude_shift = jnp.stack([params["bn_shift"][0]]
                              + params["bn_shift"][:num_layers - 1])   # (L,1,H)
    gcn_w = jnp.stack(params["gcn_w"]).astype(jnp.bfloat16)            # (L,H,H)
    gcn_b = jnp.stack(params["gcn_b"])                                  # (L,1,H)

    # head operands: padded task columns get bias -1e30 so exp() underflows to
    # 0 and the softmax over the real classes is exact.
    pred_w = jnp.pad(params["pred_w"], ((0, 0), (0, t_pad - num_tasks)))
    pred_b = jnp.pad(params["pred_b"], ((0, 0), (0, t_pad - num_tasks)),
                     constant_values=-1e30)

    out = pallas_deeper_gcn(
        x_p, enc_w, params["enc_b"], prelude_scale, prelude_shift, g, m,
        gcn_w, gcn_b,
        params["bn_scale"][num_layers - 1], params["bn_shift"][num_layers - 1],
        pred_w, pred_b, t=t)
    return out[:num_nodes, :num_tasks]


# ---------------------- pure-JAX reference (f32, unpadded) -----------------

def reference_forward(x, edge_index, params, *, num_layers, t=0.1, eps=1e-7):
    src, dst = edge_index[0], edge_index[1]
    num_nodes = x.shape[0]

    def conv(z, w, b):
        msg = jnp.maximum(z[src], 0.0) + eps                    # (E, H)
        logits = msg * t
        seg_max = jax.ops.segment_max(logits, dst, num_segments=num_nodes)
        ex = jnp.exp(logits - seg_max[dst])
        denom = jax.ops.segment_sum(ex, dst, num_segments=num_nodes)
        numer = jax.ops.segment_sum(ex * msg, dst, num_segments=num_nodes)
        agg = numer / jnp.maximum(denom, 1e-16)
        return (z + agg) @ w + b

    h = x @ params["enc_w"] + params["enc_b"]
    h = conv(h, params["gcn_w"][0], params["gcn_b"][0])
    for l in range(1, num_layers):
        z = jnp.maximum(h * params["bn_scale"][l - 1]
                        + params["bn_shift"][l - 1], 0.0)
        h = conv(z, params["gcn_w"][l], params["gcn_b"][l]) + h
    hf = jnp.maximum(h * params["bn_scale"][num_layers - 1]
                     + params["bn_shift"][num_layers - 1], 0.0)
    logits = hf @ params["pred_w"] + params["pred_b"]
    return jax.nn.log_softmax(logits, axis=-1)


# ----------------------------------- main -----------------------------------

if __name__ == "__main__":
    # small synthetic graph (hidden=128 is the module's default hidden_channels)
    NUM_NODES = 16
    NUM_EDGES = 48
    IN_CHANNELS = 8
    HIDDEN = 128
    NUM_TASKS = 4
    NUM_LAYERS = 4

    key = jax.random.PRNGKey(0)
    kx, ks, kd, kp = jax.random.split(key, 4)

    x = jax.random.normal(kx, (NUM_NODES, IN_CHANNELS), dtype=jnp.float32)
    src = jax.random.randint(ks, (NUM_EDGES,), 0, NUM_NODES, dtype=jnp.int32)
    dst = jax.random.randint(kd, (NUM_EDGES,), 0, NUM_NODES, dtype=jnp.int32)
    edge_index = jnp.stack([src, dst], axis=0)  # (2, E), PyG convention

    params = init_params(kp, IN_CHANNELS, HIDDEN, NUM_TASKS, NUM_LAYERS)

    out = deeper_gcn_forward(x, edge_index, params, num_layers=NUM_LAYERS, t=0.1)
    out = jax.block_until_ready(out)

    assert out.shape == (NUM_NODES, NUM_TASKS)

    # log_softmax rows must sum to ~1 in probability space
    row_sums = jnp.sum(jnp.exp(out), axis=-1)
    assert bool(jnp.all(jnp.abs(row_sums - 1.0) < 1e-4))

    # compare against an independent f32 segment-softmax reference
    ref = reference_forward(x, edge_index, params, num_layers=NUM_LAYERS, t=0.1)
    max_err = float(jnp.max(jnp.abs(out - ref)))
    # bf16 MXU operands + approx reciprocal => small numerical drift vs f32 ref
    assert max_err < 0.1, f"max |pallas - ref| = {max_err}"

    print("KERNEL_OK")
</pallas_src>

<mosaic_0001>
module attributes {stable_mosaic.version = 11 : i64} {
  func.func @deeper_gcn_kernel(%arg0: i32, %arg1: memref<128x128xf32, #tpu.memory_space<vmem>>, %arg2: memref<128x128xf32, #tpu.memory_space<vmem>>, %arg3: memref<1x128xf32, #tpu.memory_space<vmem>>, %arg4: memref<1x1x128xf32, #tpu.memory_space<vmem>>, %arg5: memref<1x1x128xf32, #tpu.memory_space<vmem>>, %arg6: memref<128x128xbf16, #tpu.memory_space<vmem>>, %arg7: memref<128x128xbf16, #tpu.memory_space<vmem>>, %arg8: memref<1x128x128xbf16, #tpu.memory_space<vmem>>, %arg9: memref<1x1x128xf32, #tpu.memory_space<vmem>>, %arg10: memref<1x128xf32, #tpu.memory_space<vmem>>, %arg11: memref<1x128xf32, #tpu.memory_space<vmem>>, %arg12: memref<128x128xf32, #tpu.memory_space<vmem>>, %arg13: memref<1x128xf32, #tpu.memory_space<vmem>>, %arg14: memref<128x128xf32, #tpu.memory_space<vmem>>, %arg15: memref<128x128xf32, #tpu.memory_space<vmem>>, %arg16: memref<128x256xbf16, #tpu.memory_space<vmem>>) attributes {dimension_semantics = [#tpu.dimension_semantics<arbitrary>], iteration_bounds = array<i64: 4>, scalar_prefetch = 0 : i64, scratch_operands = 2 : i64, tpu.core_type = #tpu.core_type<tc>, window_params = [{pipeline_mode = #tpu.pipeline_mode<synchronous>, transform_indices = @transform_0, window_bounds = array<i64: 128, 128>}, {pipeline_mode = #tpu.pipeline_mode<synchronous>, transform_indices = @transform_1, window_bounds = array<i64: 128, 128>}, {pipeline_mode = #tpu.pipeline_mode<synchronous>, transform_indices = @transform_2, window_bounds = array<i64: 1, 128>}, {transform_indices = @transform_3, window_bounds = array<i64: 1, 1, 128>}, {transform_indices = @transform_4, window_bounds = array<i64: 1, 1, 128>}, {pipeline_mode = #tpu.pipeline_mode<synchronous>, transform_indices = @transform_5, window_bounds = array<i64: 128, 128>}, {pipeline_mode = #tpu.pipeline_mode<synchronous>, transform_indices = @transform_6, window_bounds = array<i64: 128, 128>}, {transform_indices = @transform_7, window_bounds = array<i64: 1, 128, 128>}, {transform_indices = @transform_8, window_bounds = array<i64: 1, 1, 128>}, {pipeline_mode = #tpu.pipeline_mode<synchronous>, transform_indices = @transform_9, window_bounds = array<i64: 1, 128>}, {pipeline_mode = #tpu.pipeline_mode<synchronous>, transform_indices = @transform_10, window_bounds = array<i64: 1, 128>}, {pipeline_mode = #tpu.pipeline_mode<synchronous>, transform_indices = @transform_11, window_bounds = array<i64: 128, 128>}, {pipeline_mode = #tpu.pipeline_mode<synchronous>, transform_indices = @transform_12, window_bounds = array<i64: 1, 128>}, {pipeline_mode = #tpu.pipeline_mode<synchronous>, transform_indices = @transform_13, window_bounds = array<i64: 128, 128>}]} {
    %c0_i32 = arith.constant 0 : i32
    %0 = arith.cmpi eq, %arg0, %c0_i32 : i32
    %1 = arith.extui %0 : i1 to i32
    %c0_i32_0 = arith.constant 0 : i32
    %2 = arith.cmpi ne, %1, %c0_i32_0 : i32
    scf.if %2 {
      %c0_35 = arith.constant 0 : index
      %c0_36 = arith.constant 0 : index
      %66 = vector.load %arg1[%c0_35, %c0_36] : memref<128x128xf32, #tpu.memory_space<vmem>>, vector<128x128xf32>
      %c0_37 = arith.constant 0 : index
      %c0_38 = arith.constant 0 : index
      %67 = vector.load %arg2[%c0_37, %c0_38] : memref<128x128xf32, #tpu.memory_space<vmem>>, vector<128x128xf32>
      %cst_39 = arith.constant dense<0.000000e+00> : vector<128x128xf32>
      %68 = tpu.matmul %66, %67, %cst_39 {dimension_numbers = #tpu.dot_dimension_numbers<[1], [0], [0], [1], [0, 0, 1, 1], [], []>} : vector<128x128xf32>, vector<128x128xf32>, vector<128x128xf32> -> vector<128x128xf32>
      %c0_40 = arith.constant 0 : index
      %c0_41 = arith.constant 0 : index
      %69 = vector.load %arg3[%c0_40, %c0_41] : memref<1x128xf32, #tpu.memory_space<vmem>>, vector<1x128xf32>
      %70 = vector.broadcast %69 : vector<1x128xf32> to vector<128x128xf32>
      %71 = arith.addf %68, %70 : vector<128x128xf32>
      %c0_42 = arith.constant 0 : index
      %c0_43 = arith.constant 0 : index
      %72 = vector.load %arg15[%c0_42, %c0_43] : memref<128x128xf32, #tpu.memory_space<vmem>>, vector<128x128xf32>
      tpu.vector_store %arg15[%c0_42, %c0_43], %71 {strides = array<i32>} : memref<128x128xf32, #tpu.memory_space<vmem>>, vector<128x128xf32>,
    } else {
    }
    %c0 = arith.constant 0 : index
    %c0_1 = arith.constant 0 : index
    %3 = vector.load %arg15[%c0, %c0_1] : memref<128x128xf32, #tpu.memory_space<vmem>>, vector<128x128xf32>
    %c1_i32 = arith.constant 1 : i32
    %4 = arith.minsi %arg0, %c1_i32 : i32
    %5 = arith.sitofp %4 : i32 to f32
    %c0_2 = arith.constant 0 : index
    %c0_3 = arith.constant 0 : index
    %c0_4 = arith.constant 0 : index
    %6 = vector.load %arg4[%c0_2, %c0_3, %c0_4] : memref<1x1x128xf32, #tpu.memory_space<vmem>>, vector<1x1x128xf32>
    %7 = vector.shape_cast %6 : vector<1x1x128xf32> to vector<1x128xf32>
    %8 = vector.broadcast %7 : vector<1x128xf32> to vector<128x128xf32>
    %9 = arith.mulf %3, %8 : vector<128x128xf32>
    %c0_5 = arith.constant 0 : index
    %c0_6 = arith.constant 0 : index
    %c0_7 = arith.constant 0 : index
    %10 = vector.load %arg5[%c0_5, %c0_6, %c0_7] : memref<1x1x128xf32, #tpu.memory_space<vmem>>, vector<1x1x128xf32>
    %11 = vector.shape_cast %10 : vector<1x1x128xf32> to vector<1x128xf32>
    %12 = vector.broadcast %11 : vector<1x128xf32> to vector<128x128xf32>
    %13 = arith.addf %9, %12 : vector<128x128xf32>
    %cst = arith.constant 0.000000e+00 : f32
    %14 = vector.broadcast %cst : f32 to vector<128x128xf32>
    %15 = arith.maximumf %13, %14 : vector<128x128xf32>
    %16 = vector.broadcast %5 : f32 to vector<128x128xf32>
    %17 = arith.mulf %16, %15 : vector<128x128xf32>
    %cst_8 = arith.constant 1.000000e+00 : f32
    %18 = arith.subf %cst_8, %5 : f32
    %19 = vector.broadcast %18 : f32 to vector<128x128xf32>
    %20 = arith.mulf %19, %3 : vector<128x128xf32>
    %21 = arith.addf %17, %20 : vector<128x128xf32>
    %c0_9 = arith.constant 0 : index
    %c0_10 = arith.constant 0 : index
    %22 = vector.load %arg6[%c0_9, %c0_10] : memref<128x128xbf16, #tpu.memory_space<vmem>>, vector<128x128xbf16>
    %23 = arith.truncf %21 : vector<128x128xf32> to vector<128x128xbf16>
    %cst_11 = arith.constant dense<0.000000e+00> : vector<128x128xf32>
    %24 = tpu.matmul %22, %23, %cst_11 {dimension_numbers = #tpu.dot_dimension_numbers<[1], [0], [0], [1], [0, 0, 1, 1], [], []>} : vector<128x128xbf16>, vector<128x128xbf16>, vector<128x128xf32> -> vector<128x128xf32>
    %cst_12 = arith.constant 0.000000e+00 : f32
    %25 = vector.broadcast %cst_12 : f32 to vector<128x128xf32>
    %26 = arith.maximumf %24, %25 : vector<128x128xf32>
    %cst_13 = arith.constant 1.000000e-07 : f32
    %27 = vector.broadcast %cst_13 : f32 to vector<128x128xf32>
    %28 = arith.addf %26, %27 : vector<128x128xf32>
    %cst_14 = arith.constant 1.000000e-01 : f32
    %29 = vector.broadcast %cst_14 : f32 to vector<128x128xf32>
    %30 = arith.mulf %28, %29 : vector<128x128xf32>
    %cst_15 = arith.constant dense<0xFF800000> : vector<128xf32>
    %31 = vector.multi_reduction <maximumf>, %30, %cst_15 [0] : vector<128x128xf32> to vector<128xf32>
    %32 = vector.shape_cast %31 : vector<128xf32> to vector<1x128xf32>
    %33 = vector.broadcast %32 : vector<1x128xf32> to vector<128x128xf32>
    %34 = arith.subf %30, %33 : vector<128x128xf32>
    %35 = math.exp %34 : vector<128x128xf32>
    %36 = arith.truncf %35 : vector<128x128xf32> to vector<128x128xbf16>
    %c0_16 = arith.constant 0 : index
    %c0_17 = arith.constant 0 : index
    %37 = vector.load %arg16[%c0_16, %c0_17] : memref<128x256xbf16, #tpu.memory_space<vmem>>, vector<128x128xbf16>
    tpu.vector_store %arg16[%c0_16, %c0_17], %36 {strides = array<i32>} : memref<128x256xbf16, #tpu.memory_space<vmem>>, vector<128x128xbf16>,
    %38 = arith.mulf %35, %28 : vector<128x128xf32>
    %39 = arith.truncf %38 : vector<128x128xf32> to vector<128x128xbf16>
    %c0_18 = arith.constant 0 : index
    %c128 = arith.constant 128 : index
    %40 = vector.load %arg16[%c0_18, %c128] : memref<128x256xbf16, #tpu.memory_space<vmem>>, vector<128x128xbf16>
    tpu.vector_store %arg16[%c0_18, %c128], %39 {strides = array<i32>} : memref<128x256xbf16, #tpu.memory_space<vmem>>, vector<128x128xbf16>,
    %c0_19 = arith.constant 0 : index
    %c0_20 = arith.constant 0 : index
    %41 = vector.load %arg7[%c0_19, %c0_20] : memref<128x128xbf16, #tpu.memory_space<vmem>>, vector<128x128xbf16>
    %c0_21 = arith.constant 0 : index
    %c0_22 = arith.constant 0 : index
    %42 = vector.load %arg16[%c0_21, %c0_22] : memref<128x256xbf16, #tpu.memory_space<vmem>>, vector<128x256xbf16>
    %cst_23 = arith.constant dense<0.000000e+00> : vector<128x256xf32>
    %43 = tpu.matmul %41, %42, %cst_23 {dimension_numbers = #tpu.dot_dimension_numbers<[1], [0], [0], [1], [0, 0, 1, 1], [], []>} : vector<128x128xbf16>, vector<128x256xbf16>, vector<128x256xf32> -> vector<128x256xf32>
    %44 = vector.extract_strided_slice %43 {offsets = [0, 0], sizes = [128, 128], strides = [1, 1]} : vector<128x256xf32> to vector<128x128xf32>
    %45 = vector.extract_strided_slice %43 {offsets = [0, 128], sizes = [128, 128], strides = [1, 1]} : vector<128x256xf32> to vector<128x128xf32>
    %cst_24 = arith.constant 1.000000e-16 : f32
    %46 = vector.broadcast %cst_24 : f32 to vector<128x128xf32>
    %47 = arith.maximumf %44, %46 : vector<128x128xf32>
    %48 = tpu.reciprocal %47 {approx = true} : vector<128x128xf32> -> vector<128x128xf32>
    %49 = arith.mulf %45, %48 : vector<128x128xf32>
    %50 = arith.addf %21, %49 : vector<128x128xf32>
    %51 = arith.truncf %50 : vector<128x128xf32> to vector<128x128xbf16>
    %c0_25 = arith.constant 0 : index
    %c0_26 = arith.constant 0 : index
    %c0_27 = arith.constant 0 : index
    %52 = vector.load %arg8[%c0_25, %c0_26, %c0_27] : memref<1x128x128xbf16, #tpu.memory_space<vmem>>, vector<1x128x128xbf16>
    %53 = vector.shape_cast %52 : vector<1x128x128xbf16> to vector<128x128xbf16>
    %cst_28 = arith.constant dense<0.000000e+00> : vector<128x128xf32>
    %54 = tpu.matmul %51, %53, %cst_28 {dimension_numbers = #tpu.dot_dimension_numbers<[1], [0], [0], [1], [0, 0, 1, 1], [], []>} : vector<128x128xbf16>, vector<128x128xbf16>, vector<128x128xf32> -> vector<128x128xf32>
    %c0_29 = arith.constant 0 : index
    %c0_30 = arith.constant 0 : index
    %c0_31 = arith.constant 0 : index
    %55 = vector.load %arg9[%c0_29, %c0_30, %c0_31] : memref<1x1x128xf32, #tpu.memory_space<vmem>>, vector<1x1x128xf32>
    %56 = vector.shape_cast %55 : vector<1x1x128xf32> to vector<1x128xf32>
    %57 = vector.broadcast %56 : vector<1x128xf32> to vector<128x128xf32>
    %58 = arith.addf %54, %57 : vector<128x128xf32>
    %59 = vector.broadcast %5 : f32 to vector<128x128xf32>
    %60 = arith.mulf %59, %3 : vector<128x128xf32>
    %61 = arith.addf %58, %60 : vector<128x128xf32>
    %c0_32 = arith.constant 0 : index
    %c0_33 = arith.constant 0 : index
    %62 = vector.load %arg15[%c0_32, %c0_33] : memref<128x128xf32, #tpu.memory_space<vmem>>, vector<128x128xf32>
    tpu.vector_store %arg15[%c0_32, %c0_33], %61 {strides = array<i32>} : memref<128x128xf32, #tpu.memory_space<vmem>>, vector<128x128xf32>,
    %c3_i32 = arith.constant 3 : i32
    %63 = arith.cmpi eq, %arg0, %c3_i32 : i32
    %64 = arith.extui %63 : i1 to i32
    %c0_i32_34 = arith.constant 0 : i32
    %65 = arith.cmpi ne, %64, %c0_i32_34 : i32
    scf.if %65 {
      %c0_35 = arith.constant 0 : index
      %c0_36 = arith.constant 0 : index
      %66 = vector.load %arg10[%c0_35, %c0_36] : memref<1x128xf32, #tpu.memory_space<vmem>>, vector<1x128xf32>
      %67 = vector.broadcast %66 : vector<1x128xf32> to vector<128x128xf32>
      %68 = arith.mulf %61, %67 : vector<128x128xf32>
      %c0_37 = arith.constant 0 : index
      %c0_38 = arith.constant 0 : index
      %69 = vector.load %arg11[%c0_37, %c0_38] : memref<1x128xf32, #tpu.memory_space<vmem>>, vector<1x128xf32>
      %70 = vector.broadcast %69 : vector<1x128xf32> to vector<128x128xf32>
      %71 = arith.addf %68, %70 : vector<128x128xf32>
      %cst_39 = arith.constant 0.000000e+00 : f32
      %72 = vector.broadcast %cst_39 : f32 to vector<128x128xf32>
      %73 = arith.maximumf %71, %72 : vector<128x128xf32>
      %c0_40 = arith.constant 0 : index
      %c0_41 = arith.constant 0 : index
      %74 = vector.load %arg12[%c0_40, %c0_41] : memref<128x128xf32, #tpu.memory_space<vmem>>, vector<128x128xf32>
      %cst_42 = arith.constant dense<0.000000e+00> : vector<128x128xf32>
      %75 = tpu.matmul %73, %74, %cst_42 {dimension_numbers = #tpu.dot_dimension_numbers<[1], [0], [0], [1], [0, 0, 1, 1], [], []>} : vector<128x128xf32>, vector<128x128xf32>, vector<128x128xf32> -> vector<128x128xf32>
      %c0_43 = arith.constant 0 : index
      %c0_44 = arith.constant 0 : index
      %76 = vector.load %arg13[%c0_43, %c0_44] : memref<1x128xf32, #tpu.memory_space<vmem>>, vector<1x128xf32>
      %77 = vector.broadcast %76 : vector<1x128xf32> to vector<128x128xf32>
      %78 = arith.addf %75, %77 : vector<128x128xf32>
      %cst_45 = arith.constant dense<0xFF800000> : vector<128xf32>
      %79 = vector.multi_reduction <maximumf>, %78, %cst_45 [1] : vector<128x128xf32> to vector<128xf32>
      %80 = vector.shape_cast %79 : vector<128xf32> to vector<128x1xf32>
      %81 = vector.broadcast %80 : vector<128x1xf32> to vector<128x128xf32>
      %82 = arith.subf %78, %81 : vector<128x128xf32>
      %83 = math.exp %82 : vector<128x128xf32>
      %cst_46 = arith.constant dense<0.000000e+00> : vector<128xf32>
      %84 = vector.multi_reduction <add>, %83, %cst_46 [1] : vector<128x128xf32> to vector<128xf32>
      %85 = vector.shape_cast %84 : vector<128xf32> to vector<128x1xf32>
      %86 = math.log %85 : vector<128x1xf32>
      %87 = vector.broadcast %86 : vector<128x1xf32> to vector<128x128xf32>
      %88 = arith.subf %82, %87 : vector<128x128xf32>
      %c0_47 = arith.constant 0 : index
      %c0_48 = arith.constant 0 : index
      %89 = vector.load %arg14[%c0_47, %c0_48] : memref<128x128xf32, #tpu.memory_space<vmem>>, vector<128x128xf32>
      tpu.vector_store %arg14[%c0_47, %c0_48], %88 {strides = array<i32>} : memref<128x128xf32, #tpu.memory_space<vmem>>, vector<128x128xf32>,
    } else {
    }
    return
  }
  func.func @transform_0(%arg0: i32) -> (i32, i32) {
    %c0_i32 = arith.constant 0 : i32
    %c0_i32_0 = arith.constant 0 : i32
    %c0_i32_1 = arith.constant 0 : i32
    return %c0_i32, %c0_i32_0 : i32, i32
  }
  func.func @transform_1(%arg0: i32) -> (i32, i32) {
    %c0_i32 = arith.constant 0 : i32
    %c0_i32_0 = arith.constant 0 : i32
    %c0_i32_1 = arith.constant 0 : i32
    return %c0_i32, %c0_i32_0 : i32, i32
  }
  func.func @transform_2(%arg0: i32) -> (i32, i32) {
    %c0_i32 = arith.constant 0 : i32
    %c0_i32_0 = arith.constant 0 : i32
    %c0_i32_1 = arith.constant 0 : i32
    return %c0_i32, %c0_i32_0 : i32, i32
  }
  func.func @transform_3(%arg0: i32) -> (i32, i32, i32) {
    %c0_i32 = arith.constant 0 : i32
    %c0_i32_0 = arith.constant 0 : i32
    %c0_i32_1 = arith.constant 0 : i32
    return %arg0, %c0_i32, %c0_i32_0 : i32, i32, i32
  }
  func.func @transform_4(%arg0: i32) -> (i32, i32, i32) {
    %c0_i32 = arith.constant 0 : i32
    %c0_i32_0 = arith.constant 0 : i32
    %c0_i32_1 = arith.constant 0 : i32
    return %arg0, %c0_i32, %c0_i32_0 : i32, i32, i32
  }
  func.func @transform_5(%arg0: i32) -> (i32, i32) {
    %c0_i32 = arith.constant 0 : i32
    %c0_i32_0 = arith.constant 0 : i32
    %c0_i32_1 = arith.constant 0 : i32
    return %c0_i32, %c0_i32_0 : i32, i32
  }
  func.func @transform_6(%arg0: i32) -> (i32, i32) {
    %c0_i32 = arith.constant 0 : i32
    %c0_i32_0 = arith.constant 0 : i32
    %c0_i32_1 = arith.constant 0 : i32
    return %c0_i32, %c0_i32_0 : i32, i32
  }
  func.func @transform_7(%arg0: i32) -> (i32, i32, i32) {
    %c0_i32 = arith.constant 0 : i32
    %c0_i32_0 = arith.constant 0 : i32
    %c0_i32_1 = arith.constant 0 : i32
    return %arg0, %c0_i32, %c0_i32_0 : i32, i32, i32
  }
  func.func @transform_8(%arg0: i32) -> (i32, i32, i32) {
    %c0_i32 = arith.constant 0 : i32
    %c0_i32_0 = arith.constant 0 : i32
    %c0_i32_1 = arith.constant 0 : i32
    return %arg0, %c0_i32, %c0_i32_0 : i32, i32, i32
  }
  func.func @transform_9(%arg0: i32) -> (i32, i32) {
    %c0_i32 = arith.constant 0 : i32
    %c0_i32_0 = arith.constant 0 : i32
    %c0_i32_1 = arith.constant 0 : i32
    return %c0_i32, %c0_i32_0 : i32, i32
  }
  func.func @transform_10(%arg0: i32) -> (i32, i32) {
    %c0_i32 = arith.constant 0 : i32
    %c0_i32_0 = arith.constant 0 : i32
    %c0_i32_1 = arith.constant 0 : i32
    return %c0_i32, %c0_i32_0 : i32, i32
  }
  func.func @transform_11(%arg0: i32) -> (i32, i32) {
    %c0_i32 = arith.constant 0 : i32
    %c0_i32_0 = arith.constant 0 : i32
    %c0_i32_1 = arith.constant 0 : i32
    return %c0_i32, %c0_i32_0 : i32, i32
  }
  func.func @transform_12(%arg0: i32) -> (i32, i32) {
    %c0_i32 = arith.constant 0 : i32
    %c0_i32_0 = arith.constant 0 : i32
    %c0_i32_1 = arith.constant 0 : i32
    return %c0_i32, %c0_i32_0 : i32, i32
  }
  func.func @transform_13(%arg0: i32) -> (i32, i32) {
    %c0_i32 = arith.constant 0 : i32
    %c0_i32_0 = arith.constant 0 : i32
    %c0_i32_1 = arith.constant 0 : i32
    return %c0_i32, %c0_i32_0 : i32, i32
  }
}

</mosaic_0001>

<bundles_post_ra>
// kernel: tpu_custom_call.1
= control target key start
LH: loop header
LB: loop body
LE: loop exit
PB: predicated region body
PF: predicated region fallthrough
CT: control target
= control target key end

     0   :  { %s4388_s0 = inlined_call_operand.hbm [shape: f32[128,128], index: 0, kind: input, shape index: {}]   ;;  %s4389_s1 = inlined_call_operand.hbm [shape: f32[128,128], index: 1, kind: input, shape index: {}]   ;;  %s4390_s2 = inlined_call_operand.vmem [shape: f32[1,128], index: 2, kind: input, shape index: {}]   ;;  %s4391_s3 = inlined_call_operand.vmem [shape: f32[4,1,128], index: 3, kind: input, shape index: {}]   ;;  %s4392_s4 = inlined_call_operand.hbm [shape: f32[4,1,128], index: 4, kind: input, shape index: {}]   ;;  %s4393_s5 = inlined_call_operand.hbm [shape: bf16[128,128], index: 5, kind: input, shape index: {}]   ;;  %s4394_s6 = inlined_call_operand.hbm [shape: bf16[128,128], index: 6, kind: input, shape index: {}]   ;;  %s4395_s7 = inlined_call_operand.hbm [shape: bf16[4,128,128], index: 7, kind: input, shape index: {}]   ;;  %s4396_s8 = inlined_call_operand.vmem [shape: f32[4,1,128], index: 8, kind: input, shape index: {}]   ;;  %s4397_s9 = inlined_call_operand.vmem [shape: f32[1,128], index: 9, kind: input, shape index: {}]   ;;  %s4398_s10 = inlined_call_operand.vmem [shape: f32[1,128], index: 10, kind: input, shape index: {}]   ;;  %s4399_s11 = inlined_call_operand.hbm [shape: f32[128,128], index: 11, kind: input, shape index: {}]   ;;  %s4400_s12 = inlined_call_operand.vmem [shape: f32[1,128], index: 12, kind: input, shape index: {}]   ;;  %s4401_s13 = inlined_call_operand.hbm [shape: f32[128,128], index: 13, kind: output, shape index: {}]  }
   0x1   :  { %4428 = sst [smem:[#allocation36_spill]] %s4388_s0 }
   0x2   :  { %4429 = sst [smem:[#allocation37_spill]] %s4389_s1 }
   0x3   :  { %4430 = sst [smem:[#allocation38_spill]] %s4392_s4 }
   0x4   :  { %4431 = sst [smem:[#allocation39_spill]] %s4393_s5 }
   0x5   :  { %4432 = sst [smem:[#allocation40_spill]] %s4401_s13 }
   0x6   :  { %18 = vsyncpa [#allocation5], 0 }
   0x7   :  { %19 = vsyncpa [#allocation8], 0 }
   0x8   :  { %20 = vsyncpa [#allocation12], 0 }
   0x9   :  { %21 = vsyncpa [#allocation6], 0  ;;  %s3620_s25 = smov 0   ;;  %s3622_s26 = smov 0  }
   0xa   :  { %s3624_s27 = smov 0   ;;  %s3626_s28 = smov 0  }
   0xb LB: > { %4433 = sst [smem:[#allocation24_spill]] %s3529_s27  ;;  %s3535_s29 = smov [#allocation4]   ;;  %s3533_s28 = sphi %s3626_s28, %s4483_s28   ;;  %s3529_s27 = sphi %s3624_s27, %s4488_s27   ;;  %s3525_s26 = sphi %s3622_s26, %s4487_s26   ;;  %s3521_s25 = sphi %s3620_s25, %s4486_s25  }
   0xc   : > { %s358_s30 = sshll.u32 %s3535_s29, 4  ;;  %s3641_s14 = sadd.s32 4294967295, %s3533_s28   ;;  %s359_s30 = int_to_ptr.vmem [resolvable:$true] %s358_s30 }
   0xd   : > { %p2488_p0 = scmp.ge.s32.totalorder %s3533_s28, 1  ;;  %p4411_p1 = scmp.eq.s32.totalorder %s3641_s14, 0 }
   0xe   : > { %p346_p2 = scmp.lt.s32.totalorder %s3533_s28, 5  ;;  %s3536_s16 = smov [#allocation7]  }
   0xf   : > { %s371_s17 = sshll.u32 %s3536_s16, 4  ;;  %s3537_s19 = smov [#allocation10]   ;;  %s3659_s17 = int_to_ptr.vmem [resolvable:$true] %s371_s17 }
  0x10   : > { %p3647_p4 = pnand %p2488_p0, %p346_p2  ;;  %s387_s20 = sshll.u32 %s3537_s19, 4  ;;  %s3661_s20 = int_to_ptr.vmem [resolvable:$true] %s387_s20 }
  0x11   : > { %s3272_s22 = scalar_lea.vmem %s359_s30, 2048  ;;  %p3280_p11 = scmp.lt.s32.totalorder %s359_s30, %s359_s30 }
  0x12   : > { %s4434_s15 = scalar_select %p3647_p4, 1, 0 }
  0x13   : > { %p2988_p5 = pneg %p3647_p4  ;;  %p3273_p8 = scmp.ne.s32.totalorder %s359_s30, %s3272_s22 }
  0x14   : > { %p3281_p12 = scmp.lt.s32.totalorder %s3272_s22, %s3272_s22 }
  0x15   : > { %p3655_p6 = pnand %p2988_p5, %p4411_p1 }
  0x16   : > { %p3282_p13 = por %p3281_p12, %p3280_p11 }
  0x17   : > { %s4435_s18 = scalar_select %p3655_p6, 1, 0 }
  0x18   : > { %p3665_p7 = pneg %p3655_p6 }
  0x1a   : > { %p3275_p9 = pnand %p3273_p8, %p3665_p7 }
  0x1c   : > { %p3276_p10 = pneg %p3275_p9 }
  0x1e   : > { %p3283_p0 = pnand %p3282_p13, %p3276_p10 }
  0x20   : > { %3286 = shalt.err (!%p3283_p0)
}
  0x21   : > { %s4402_s23 = smov 128   ;;  %s4403_s24 = smov 8  }
  0x22   : > { %s4437_s0 = sld [smem:[#allocation36_spill]]  ;;  %s3298_s19 = scalar_lea.vmem %s3659_s17, 2048 }
  0x23   : > { %p3299_p2 = scmp.ne.s32.totalorder %s3659_s17, %s3298_s19  ;;  %p3306_p9 = scmp.lt.s32.totalorder %s3659_s17, %s3659_s17 }
  0x24   : > { %p3307_p10 = scmp.lt.s32.totalorder %s3298_s19, %s3298_s19 }
  0x25   : > { %p3301_p5 = pnand %p3299_p2, %p3665_p7 }
  0x26   : > { %p3308_p11 = por %p3307_p10, %p3306_p9 }
  0x27   : > { %p3302_p8 = pneg %p3301_p5 }
  0x28   : > { %2991 = dma.hbm_to_vmem [thread:$0]  (!%p3655_p6), %s4437_s0, 2048, %s359_s30, [#allocation5], %s4402_s23, %s4402_s23, %s4403_s24  }
  0x29   : > { %p3309_p12 = pnand %p3308_p11, %p3302_p8 }
  0x2b   : > { %3312 = shalt.err (!%p3309_p12)
}
  0x2c   : > { %s4438_s1 = sld [smem:[#allocation37_spill]]  ;;  %s3324_s30 = scalar_lea.vmem %s3661_s20, 1024 }
  0x2d   : > { %p3325_p13 = scmp.ne.s32.totalorder %s3661_s20, %s3324_s30  ;;  %p3332_p5 = scmp.lt.s32.totalorder %s3661_s20, %s3661_s20 }
  0x2e   : > { %p3333_p8 = scmp.lt.s32.totalorder %s3324_s30, %s3324_s30 }
  0x2f   : > { %p3327_p0 = pnand %p3325_p13, %p3665_p7 }
  0x30   : > { %p3334_p9 = por %p3333_p8, %p3332_p5 }
  0x31   : > { %p3328_p2 = pneg %p3327_p0 }
  0x32   : > { %2994 = dma.hbm_to_vmem [thread:$0]  (!%p3655_p6), %s4438_s1, 2048, %s3659_s17, [#allocation8], %s4402_s23, %s4402_s23, %s4403_s24  }
  0x33   : > { %p3335_p10 = pnand %p3334_p9, %p3328_p2 }
  0x35   : > { %3338 = shalt.err (!%p3335_p10)
}
  0x36   : > { %s4404_s16 = smov 64   ;;  %s4406_s17 = smov 4  }
  0x37   : > { %s4439_s5 = sld [smem:[#allocation39_spill]]  ;;  %s3710_s29 = sadd.s32 1, %s3533_s28  }
  0x38   : > { %4440 = sst [smem:[#allocation25_spill]] %s3710_s29  ;;  %s120_s30 = ssub.s32 %s3533_s28, %s3710_s29 }
  0x39   : > { %s123_s23 = sadd.s32 1, %s3529_s27  ;;  %p121_p11 = scmp.eq.s32.totalorder %s120_s30, 0 }
  0x3a   : > { %p130_p12 = scmp.ne.s32.totalorder %s3529_s27, %s3525_s26  ;;  %p131_p13 = scmp.eq.s32.totalorder %s3533_s28, 0 }
  0x3b   : > { %p136_p0 = scmp.ne.s32.totalorder %s3525_s26, %s3521_s25  ;;  %p3016_p8 = scmp.lt.s32.totalorder %s3533_s28, 4 }
  0x3c   : > { %s3721_s24 = scalar_select %p121_p11, %s3529_s27, %s123_s23  }
  0x3d   : > { %2997 = dma.hbm_to_vmem [thread:$0]  (!%p3655_p6), %s4439_s5, 1024, %s3661_s20, [#allocation8], %s4404_s16, %s4404_s16, %s4406_s17  }
  0x3e   : > { %4441 = sst [smem:[#allocation26_spill]] %s3721_s24  ;;  %p132_p2 = por %p131_p13, %p130_p12 }
  0x3f   : > { %p3725_p5 = por %p4411_p1, %p136_p0  ;;  %s442_s19 = sand.u32 1, %s3533_s28  }
  0x40   : > { %s444_s20 = sand.u32 1, %s3529_s27   ;;  %s2495_s22 = sshll.u32 %s3533_s28, 4 }
  0x41   : > { %s4442_s0 = scalar_select %p3725_p5, 1, 0 }
  0x42   : > { %s4443_s4 = sld [smem:[#allocation38_spill]]  ;;  %s445_s25 = scalar_lea.vmem [#allocation9], %s444_s20 }
  0x43   : > { %s452_s23 = sshll.u32 %s445_s25, 4  ;;  %p3740_p9 = pnand %p3016_p8, %p132_p2  ;;  %s3738_s23 = int_to_ptr.vmem [resolvable:$true] %s452_s23 }
  0x44   : > { %s2496_s5 = sshll.u32 %s444_s20, 6  ;;  %s3744_s24 = scalar_lea.sflag [#allocation5], %s442_s19 }
  0x45   : > { %p3341_p11 = pneg %p3740_p9 }
  0x48   : > { %s3736_s1 = scalar_lea.hbm %s4443_s4, %s2495_s22  ;;  %s3344_s22 = scalar_lea.hbm %s4443_s4, 64 }
  0x49   : > { %s3339_s27 = scalar_lea.hbm %s3736_s1, 16  ;;  %p3345_p0 = scmp.lt.s32.totalorder %s3736_s1, %s4443_s4 }
  0x4a   : > { %p3340_p10 = scmp.ne.s32.totalorder %s3736_s1, %s3339_s27  ;;  %p3346_p2 = scmp.lt.s32.totalorder %s3344_s22, %s3339_s27 }
  0x4c   : > { %p3342_p12 = pnand %p3341_p11, %p3340_p10  ;;  %p3347_p8 = por %p3346_p2, %p3345_p0 }
  0x4e   : > { %p3343_p13 = pneg %p3342_p12 }
  0x50   : > { %p3348_p3 = pnand %p3347_p8, %p3343_p13 }
  0x52   : > { %3351 = shalt.err (!%p3348_p3)
}
  0x53   : > { %s3352_s19 = scalar_lea.vmem %s3738_s23, 16  ;;  %s3542_s20 = smov [#allocation9]  }
  0x54   : > { %p3353_p1 = scmp.ne.s32.totalorder %s3738_s23, %s3352_s19  ;;  %s3357_s16 = sshll.u32 %s3542_s20, 4  ;;  %s3358_s16 = int_to_ptr.vmem [resolvable:$false] %s3357_s16 }
  0x55   : > { %s3359_s17 = scalar_lea.vmem %s3358_s16, 32  ;;  %p3360_p5 = scmp.lt.s32.totalorder %s3738_s23, %s3358_s16 }
  0x56   : > { %p3355_p10 = pnand %p3353_p1, %p3341_p11  ;;  %p3361_p4 = scmp.lt.s32.totalorder %s3359_s17, %s3352_s19 }
  0x58   : > { %p3356_p12 = pneg %p3355_p10  ;;  %p3362_p6 = por %p3361_p4, %p3360_p5 }
  0x5a   : > { %p3363_p0 = pnand %p3362_p6, %p3356_p12 }
  0x5c   : > { %3366 = shalt.err (!%p3363_p0)
}
  0x5d   : > { %3007 = dma.hbm_to_vmem [thread:$0]  (!%p3740_p9), %s3736_s1, 16, %s3738_s23, %s3744_s24  }
  0x5e   : > { %s463_s27 = scalar_lea.vmem [#allocation13], %s2496_s5  ;;  %s3543_s22 = smov [#allocation11]  }
  0x5f   : > { %s470_s29 = sshll.u32 %s463_s27, 4  ;;  %s400_s25 = sshll.u32 %s3543_s22, 4  ;;  %s3771_s29 = int_to_ptr.vmem [resolvable:$true] %s470_s29  ;;  %s401_s25 = int_to_ptr.vmem [resolvable:$true] %s400_s25 }
  0x60   : > { %s3378_s20 = scalar_lea.vmem %s401_s25, 1024  ;;  %p3386_p6 = scmp.lt.s32.totalorder %s401_s25, %s401_s25 }
  0x61   : > { %p3379_p1 = scmp.ne.s32.totalorder %s401_s25, %s3378_s20  ;;  %p3387_p5 = scmp.lt.s32.totalorder %s3378_s20, %s3378_s20 }
  0x63   : > { %p3381_p3 = pnand %p3379_p1, %p3665_p7  ;;  %p3388_p13 = por %p3387_p5, %p3386_p6 }
  0x65   : > { %p3382_p4 = pneg %p3381_p3 }
  0x67   : > { %p3389_p2 = pnand %p3388_p13, %p3382_p4 }
  0x69   : > { %3392 = shalt.err (!%p3389_p2)
}
  0x6a   : > { %p4445_p8 = scmp.ne.s32.totalorder %s4435_s18, 0  ;;  %s4446_s1 = smov 4  }
  0x6b   : > { %s4447_s5 = smov 64   ;;  %s2591_s16 = sshll.u32 %s3533_s28, 10 }
  0x6c   : > { %3000 = dma.hbm_to_vmem [thread:$0]  (!%p4445_p8), %s4394_s6, 1024, %s401_s25, [#allocation12], %s4447_s5, %s4447_s5, %s4446_s1  }
  0x6d   : > { %s3544_s17 = smov [#allocation14]   ;;  %s3787_s20 = scalar_lea.hbm %s4395_s7, %s2591_s16 }
  0x6e   : > { %s419_s27 = sshll.u32 %s3544_s17, 4  ;;  %s420_s27 = int_to_ptr.vmem [resolvable:$true] %s419_s27 }
  0x6f   : > { %s3404_s13 = scalar_lea.vmem %s420_s27, 2048  ;;  %p3412_p1 = scmp.lt.s32.totalorder %s420_s27, %s420_s27 }
  0x70   : > { %p3405_p10 = scmp.ne.s32.totalorder %s420_s27, %s3404_s13  ;;  %p3413_p3 = scmp.lt.s32.totalorder %s3404_s13, %s3404_s13 }
  0x72   : > { %p3407_p12 = pnand %p3405_p10, %p3665_p7  ;;  %p3414_p4 = por %p3413_p3, %p3412_p1 }
  0x74   : > { %p3408_p0 = pneg %p3407_p12 }
  0x76   : > { %p3415_p6 = pnand %p3414_p4, %p3408_p0 }
  0x78   : > { %3418 = shalt.err (!%p3415_p6)
}
  0x79   : > { %s4448_s28 = smov 8   ;;  %s4449_s25 = smov 128  }
  0x7a   : > { %3003 = dma.hbm_to_vmem [thread:$0]  (!%p4445_p8), %s4399_s11, 2048, %s420_s27, [#allocation8], %s4449_s25, %s4449_s25, %s4448_s28  }
  0x7b   : > { %s3419_s21 = scalar_lea.hbm %s3787_s20, 1024  ;;  %s3424_s18 = scalar_lea.hbm %s4395_s7, 4096 }
  0x7c   : > { %p3420_p7 = scmp.ne.s32.totalorder %s3787_s20, %s3419_s21  ;;  %p3425_p2 = scmp.lt.s32.totalorder %s3787_s20, %s4395_s7 }
  0x7d   : > { %p3426_p10 = scmp.lt.s32.totalorder %s3424_s18, %s3419_s21 }
  0x7e   : > { %p3422_p5 = pnand %p3420_p7, %p3341_p11 }
  0x7f   : > { %p3427_p12 = por %p3426_p10, %p3425_p2 }
  0x80   : > { %p3423_p13 = pneg %p3422_p5 }
  0x82   : > { %p3428_p0 = pnand %p3427_p12, %p3423_p13 }
  0x84   : > { %3431 = shalt.err (!%p3428_p0)
}
  0x85   : > { %s3432_s27 = scalar_lea.vmem %s3771_s29, 1024  ;;  %s3545_s22 = smov [#allocation13]  }
  0x86   : > { %p3433_p8 = scmp.ne.s32.totalorder %s3771_s29, %s3432_s27  ;;  %s3437_s28 = sshll.u32 %s3545_s22, 4  ;;  %s3438_s28 = int_to_ptr.vmem [resolvable:$false] %s3437_s28 }
  0x87   : > { %s3439_s25 = scalar_lea.vmem %s3438_s28, 2048  ;;  %p3440_p4 = scmp.lt.s32.totalorder %s3771_s29, %s3438_s28 }
  0x88   : > { %p3435_p1 = pnand %p3433_p8, %p3341_p11  ;;  %p3441_p6 = scmp.lt.s32.totalorder %s3439_s25, %s3432_s27 }
  0x8a   : > { %p3436_p3 = pneg %p3435_p1  ;;  %p3442_p7 = por %p3441_p6, %p3440_p4 }
  0x8c   : > { %p3443_p5 = pnand %p3442_p7, %p3436_p3 }
  0x8e   : > { %3446 = shalt.err (!%p3443_p5)
}
  0x8f   : > { %3010 = dma.hbm_to_vmem [thread:$0]  (!%p3740_p9), %s3787_s20, 1024, %s3771_s29, %s3744_s24, %s4447_s5, %s4447_s5, %s4446_s1  }
  0x90   : > { %p4450_p11 = scmp.ne.s32.totalorder %s4434_s15, 0 }
  0x92   : > { %488 = sbr.rel (%p4450_p11) target bundleno = 1865 (0x749), region = 72 }
  0x97   : > { %p4451_p13 = scmp.eq.s32.totalorder %s3641_s14, 0 }
  0x99   : > { %3488 = dma.done.wait (%p4451_p13), [#allocation5], 2048   ;;  %p4452_p2 = pmov %p4451_p13 }
  0x9b   : > { %3490 = vsyncadd (%p4452_p2), [#allocation5], 4294965248  ;;  %p4453_p10 = pmov %p4452_p2 }
  0x9c   : > { %p4454_p12 = pmov %p4452_p2 }
  0x9d   : > { %3492 = dma.done.wait (%p4453_p10), [#allocation8], 2048  }
  0x9e   : > { %3494 = vsyncadd (%p4454_p12), [#allocation8], 4294965248  ;;  %s498_s30 = sand.u32 1, %s3641_s14   ;;  %s500_s24 = sand.u32 1, %s3525_s26  }
  0x9f   : > { %s499_s29 = scalar_lea.sflag [#allocation5], %s498_s30  ;;  %s3837_s15 = scalar_lea.vmem [#allocation9], %s500_s24 }
  0xa0   : > { %p4455_p9 = scmp.ne.s32.totalorder %s4442_s0, 0 }
  0xa2   : > { %3496 = dma.done.wait (%p4455_p9), %s499_s29, 16  }
  0xa3   : > { %3498 = vsyncadd (%p4455_p9), %s499_s29, 4294967280  ;;  %p4456_p0 = pmov %p4452_p2 }
  0xa5   : > { %3500 = dma.done.wait (%p4456_p0), [#allocation8], 1024   ;;  %p4457_p8 = pmov %p4456_p0 }
  0xa6   : > { %p4458_p1 = pmov %p4456_p0 }
  0xa7   : > { %3502 = vsyncadd (%p4457_p8), [#allocation8], 4294966272 }
  0xa8   : > { %3504 = dma.done.wait (%p4458_p1), [#allocation12], 1024   ;;  %p4459_p3 = pmov %p4456_p0 }
  0xa9   : > { %s2504_s1 = sshll.u32 %s500_s24, 6 }
  0xaa   : > { %3506 = vsyncadd (%p4459_p3), [#allocation12], 4294966272  ;;  %s3851_s5 = scalar_lea.vmem [#allocation13], %s2504_s1 }
  0xab   : > { %3508 = dma.done.wait (%p4455_p9), %s499_s29, 1024  }
  0xac   : > { %3510 = vsyncadd (%p4455_p9), %s499_s29, 4294966272  ;;  %p4460_p4 = pmov %p4456_p0 }
  0xad   : > { %p4461_p6 = pmov %p4456_p0 }
  0xae   : > { %3512 = dma.done.wait (%p4460_p4), [#allocation8], 2048  }
  0xaf   : > { %3514 = vsyncadd (%p4461_p6), [#allocation8], 4294965248  ;;  %p570_p7 = scmp.lt.s32.totalorder %s3641_s14, 3  ;;  %p4462_p5 = scmp.ne.s32.totalorder %s3641_s14, 0 }
  0xb1   : > { %s3863_s20 = scalar_select %p570_p7, %s3641_s14, 3 }
  0xb2   : > { %580 = sbr.rel (%p4462_p5) target bundleno = 427 (0x1ab), region = 104 }
  0xb3   : > { %s572_s21 = scalar_lea.vmem %s4391_s3, %s3863_s20  ;;  %s575_s19 = scalar_lea.vmem %s4396_s8, %s3863_s20 }
  0xb7   : > { %v612_v0 = vld [vmem:[#allocation7 + $0x78] sm:$0xff]  ;;  %v611_v1 = vld [vmem:[#allocation7 + $0x70] sm:$0xff]  ;;  %v610_v2 = vld [vmem:[#allocation7 + $0x68] sm:$0xff] }
  0xb8   : > { %2720 = vmatprep.subr.mxu0 %v612_v0  ;;  %2896 = vmatprep.subr.mxu1 %v612_v0  ;;  %v609_v3 = vld [vmem:[#allocation7 + $0x60] sm:$0xff]  ;;  %v608_v4 = vld [vmem:[#allocation7 + $0x58] sm:$0xff]  ;;  %v607_v5 = vld [vmem:[#allocation7 + $0x50] sm:$0xff] }
  0xb9   : > { %2721 = vmatpush3.msra.mxu0 %v612_v0  ;;  %2912 = vmatpush3.msra.mxu1 %v612_v0  ;;  %v606_v6 = vld [vmem:[#allocation7 + $0x48] sm:$0xff]  ;;  %v605_v7 = vld [vmem:[#allocation7 + $0x40] sm:$0xff]  ;;  %v604_v8 = vld [vmem:[#allocation7 + $0x38] sm:$0xff] }
  0xba   : > { %2722 = vmatprep.subr.mxu0 %v611_v1  ;;  %2897 = vmatprep.subr.mxu1 %v611_v1  ;;  %v603_v9 = vld [vmem:[#allocation7 + $0x30] sm:$0xff]  ;;  %v602_v10 = vld [vmem:[#allocation7 + $0x28] sm:$0xff]  ;;  %v601_v11 = vld [vmem:[#allocation7 + $0x20] sm:$0xff] }
  0xbb   : > { %2723 = vmatpush3.msra.mxu0 %v611_v1  ;;  %2913 = vmatpush3.msra.mxu1 %v611_v1  ;;  %v600_v12 = vld [vmem:[#allocation7 + $0x18] sm:$0xff]  ;;  %v599_v13 = vld [vmem:[#allocation7 + $0x10] sm:$0xff]  ;;  %v598_v14 = vld [vmem:[#allocation7 + $0x8] sm:$0xff] }
  0xbc   : > { %2724 = vmatprep.subr.mxu0 %v610_v2  ;;  %2898 = vmatprep.subr.mxu1 %v610_v2  ;;  %v597_v15 = vld [vmem:[#allocation7] sm:$0xff]  ;;  %v582_v18 = vld [vmem:[#allocation4 + $0x8] sm:$0xff]  ;;  %v583_v20 = vld [vmem:[#allocation4 + $0x10] sm:$0xff] }
  0xbd   : > { %2725 = vmatpush3.msra.mxu0 %v610_v2  ;;  %2914 = vmatpush3.msra.mxu1 %v610_v2  ;;  %v581_v16 = vld [vmem:[#allocation4] sm:$0xff]  ;;  %v590_v19 = vld [vmem:[#allocation4 + $0x48] sm:$0xff]  ;;  %v591_v21 = vld [vmem:[#allocation4 + $0x50] sm:$0xff] }
  0xbe   : > { %2726 = vmatprep.subr.mxu0 %v609_v3  ;;  %2899 = vmatprep.subr.mxu1 %v609_v3  ;;  %v589_v17 = vld [vmem:[#allocation4 + $0x40] sm:$0xff]  ;;  %v584_v22 = vld [vmem:[#allocation4 + $0x18] sm:$0xff]  ;;  %v586_v26 = vld [vmem:[#allocation4 + $0x28] sm:$0xff] }
  0xbf   : > { %2727 = vmatpush3.msra.mxu0 %v609_v3  ;;  %2915 = vmatpush3.msra.mxu1 %v609_v3  ;;  %v592_v23 = vld [vmem:[#allocation4 + $0x58] sm:$0xff]  ;;  %v585_v24 = vld [vmem:[#allocation4 + $0x20] sm:$0xff]  ;;  %v594_v27 = vld [vmem:[#allocation4 + $0x68] sm:$0xff] }
  0xc0   : > { %2728 = vmatprep.subr.mxu0 %v608_v4  ;;  %2900 = vmatprep.subr.mxu1 %v608_v4  ;;  %v593_v25 = vld [vmem:[#allocation4 + $0x60] sm:$0xff]  ;;  %v587_v28 = vld [vmem:[#allocation4 + $0x30] sm:$0xff]  ;;  %v588_v30 = vld [vmem:[#allocation4 + $0x38] sm:$0xff] }
  0xc1   : > { %2729 = vmatpush3.msra.mxu0 %v608_v4  ;;  %2916 = vmatpush3.msra.mxu1 %v608_v4  ;;  %v595_v29 = vld [vmem:[#allocation4 + $0x70] sm:$0xff]  ;;  %v596_v31 = vld [vmem:[#allocation4 + $0x78] sm:$0xff]  ;;  %v2507_v32 = vld [vmem:[%s4390_s2] ss:$0 sm:$0xff] }
  0xc2   : > { %2730 = vmatprep.subr.mxu0 %v607_v5  ;;  %2901 = vmatprep.subr.mxu1 %v607_v5 }
  0xc3   : > { %2731 = vmatpush3.msra.mxu0 %v607_v5  ;;  %2917 = vmatpush3.msra.mxu1 %v607_v5 }
  0xc4   : > { %2732 = vmatprep.subr.mxu0 %v606_v6  ;;  %2902 = vmatprep.subr.mxu1 %v606_v6 }
  0xc5   : > { %2733 = vmatpush3.msra.mxu0 %v606_v6  ;;  %2918 = vmatpush3.msra.mxu1 %v606_v6 }
  0xc6   : > { %2734 = vmatprep.subr.mxu0 %v605_v7  ;;  %2903 = vmatprep.subr.mxu1 %v605_v7 }
  0xc7   : > { %2735 = vmatpush3.msra.mxu0 %v605_v7  ;;  %2919 = vmatpush3.msra.mxu1 %v605_v7 }
  0xc8   : > { %2736 = vmatprep.subr.mxu0 %v604_v8  ;;  %2904 = vmatprep.subr.mxu1 %v604_v8 }
  0xc9   : > { %2737 = vmatpush3.msra.mxu0 %v604_v8  ;;  %2920 = vmatpush3.msra.mxu1 %v604_v8 }
  0xca   : > { %2738 = vmatprep.subr.mxu0 %v603_v9  ;;  %2905 = vmatprep.subr.mxu1 %v603_v9 }
  0xcb   : > { %2739 = vmatpush3.msra.mxu0 %v603_v9  ;;  %2921 = vmatpush3.msra.mxu1 %v603_v9 }
  0xcc   : > { %2740 = vmatprep.subr.mxu0 %v602_v10  ;;  %2906 = vmatprep.subr.mxu1 %v602_v10 }
  0xcd   : > { %2741 = vmatpush3.msra.mxu0 %v602_v10  ;;  %2922 = vmatpush3.msra.mxu1 %v602_v10 }
  0xce   : > { %2742 = vmatprep.subr.mxu0 %v601_v11  ;;  %2907 = vmatprep.subr.mxu1 %v601_v11 }
  0xcf   : > { %2743 = vmatpush3.msra.mxu0 %v601_v11  ;;  %2923 = vmatpush3.msra.mxu1 %v601_v11 }
  0xd0   : > { %2744 = vmatprep.subr.mxu0 %v600_v12  ;;  %2908 = vmatprep.subr.mxu1 %v600_v12 }
  0xd1   : > { %2745 = vmatpush3.msra.mxu0 %v600_v12  ;;  %2924 = vmatpush3.msra.mxu1 %v600_v12 }
  0xd2   : > { %2746 = vmatprep.subr.mxu0 %v599_v13  ;;  %2909 = vmatprep.subr.mxu1 %v599_v13 }
  0xd3   : > { %2747 = vmatpush3.msra.mxu0 %v599_v13  ;;  %2925 = vmatpush3.msra.mxu1 %v599_v13 }
  0xd4   : > { %2748 = vmatprep.subr.mxu0 %v598_v14  ;;  %2910 = vmatprep.subr.mxu1 %v598_v14 }
  0xd5   : > { %2749 = vmatpush3.msra.mxu0 %v598_v14  ;;  %2926 = vmatpush3.msra.mxu1 %v598_v14 }
  0xd6   : > { %2750 = vmatprep.subr.mxu0 %v597_v15  ;;  %2911 = vmatprep.subr.mxu1 %v597_v15 }
  0xd7   : > { %2751 = vmatpush3.msra.mxu0 %v597_v15  ;;  %2927 = vmatpush3.msra.mxu1 %v597_v15 }
  0xd8   : > { %2752 = vmatprep.mubr.f32.mxu0 %v581_v16  ;;  %2764 = vmatprep.mubr.f32.mxu1 %v589_v17 }
  0xd9   : > { %2753 = vmatmul.mubr.f32.vlgmr.msra.gmra.mxu0 %v582_v18  ;;  %2765 = vmatmul.mubr.f32.vlgmr.msra.gmra.mxu1 %v590_v19 }
  0xda   : > { %2755 = vmatprep.mubr.f32.mxu0 %v583_v20  ;;  %2767 = vmatprep.mubr.f32.mxu1 %v591_v21 }
  0xdd   : > { %2756 = vmatmul.mubr.f32.gmra.mxu0 %v584_v22  ;;  %2768 = vmatmul.mubr.f32.gmra.mxu1 %v592_v23 }
  0xde   : > { %2758 = vmatprep.mubr.f32.mxu0 %v585_v24  ;;  %2770 = vmatprep.mubr.f32.mxu1 %v593_v25 }
  0xe1   : > { %2759 = vmatmul.mubr.f32.gmra.mxu0 %v586_v26  ;;  %2771 = vmatmul.mubr.f32.gmra.mxu1 %v594_v27 }
  0xe2   : > { %2761 = vmatprep.mubr.f32.mxu0 %v587_v28  ;;  %2773 = vmatprep.mubr.f32.mxu1 %v595_v29 }
  0xe5   : > { %2762 = vmatmul.mubr.f32.gmra.mxu0 %v588_v30  ;;  %2774 = vmatmul.mubr.f32.gmra.mxu1 %v596_v31 }
 0x199   : > { %v2754_v33 = vpop.f32.mrf.mxu0  ;;  %v2766_v34 = vpop.f32.mrf.mxu1 }
 0x19a   : > { %v692_v35 = vadd.f32 %v2754_v33, %v2507_v32  ;;  %v732_v36 = vadd.f32 %v2766_v34, %v2507_v32 }
 0x19b   : > { %v686_v37 = vpop.f32.mrf.mxu0  ;;  %v726_v38 = vpop.f32.mrf.mxu1 }
 0x19c   : > { %766 = vst [vmem:[#allocation2] sm:$0xff] %v692_v35  ;;  %774 = vst [vmem:[#allocation2 + $0x20] sm:$0xff] %v732_v36  ;;  %v687_v39 = vadd.f32 %v2507_v32, %v686_v37  ;;  %v727_v40 = vadd.f32 %v2507_v32, %v726_v38 }
 0x19d   : > { %v2757_v41 = vpop.f32.mrf.mxu0  ;;  %v2769_v42 = vpop.f32.mrf.mxu1 }
 0x19e   : > { %765 = vst [vmem:[#allocation2 + $0x30] sm:$0xff] %v687_v39  ;;  %773 = vst [vmem:[#allocation2 + $0x40] sm:$0xff] %v727_v40  ;;  %v702_v43 = vadd.f32 %v2757_v41, %v2507_v32  ;;  %v742_v44 = vadd.f32 %v2769_v42, %v2507_v32 }
 0x19f   : > { %v696_v45 = vpop.f32.mrf.mxu0  ;;  %v736_v46 = vpop.f32.mrf.mxu1 }
 0x1a0   : > { %768 = vst [vmem:[#allocation2 + $0x18] sm:$0xff] %v702_v43  ;;  %776 = vst [vmem:[#allocation2 + $0x38] sm:$0xff] %v742_v44  ;;  %v697_v47 = vadd.f32 %v2507_v32, %v696_v45  ;;  %v737_v48 = vadd.f32 %v2507_v32, %v736_v46 }
 0x1a1   : > { %v2760_v49 = vpop.f32.mrf.mxu0  ;;  %v2772_v50 = vpop.f32.mrf.mxu1 }
 0x1a2   : > { %767 = vst [vmem:[#allocation2 + $0x58] sm:$0xff] %v697_v47  ;;  %775 = vst [vmem:[#allocation2 + $0x10] sm:$0xff] %v737_v48  ;;  %v712_v51 = vadd.f32 %v2760_v49, %v2507_v32  ;;  %v752_v52 = vadd.f32 %v2772_v50, %v2507_v32 }
 0x1a3   : > { %v706_v53 = vpop.f32.mrf.mxu0  ;;  %v746_v54 = vpop.f32.mrf.mxu1 }
 0x1a4   : > { %770 = vst [vmem:[#allocation2 + $0x68] sm:$0xff] %v712_v51  ;;  %778 = vst [vmem:[#allocation2 + $0x70] sm:$0xff] %v752_v52  ;;  %v707_v55 = vadd.f32 %v2507_v32, %v706_v53  ;;  %v747_v56 = vadd.f32 %v2507_v32, %v746_v54 }
 0x1a5   : > { %v2763_v57 = vpop.f32.mrf.mxu0  ;;  %v2775_v58 = vpop.f32.mrf.mxu1 }
 0x1a6   : > { %769 = vst [vmem:[#allocation2 + $0x50] sm:$0xff] %v707_v55  ;;  %777 = vst [vmem:[#allocation2 + $0x60] sm:$0xff] %v747_v56  ;;  %v722_v59 = vadd.f32 %v2763_v57, %v2507_v32  ;;  %v762_v60 = vadd.f32 %v2775_v58, %v2507_v32 }
 0x1a7   : > { %v716_v61 = vpop.f32.mrf.mxu0  ;;  %v756_v62 = vpop.f32.mrf.mxu1 }
 0x1a8   : > { %772 = vst [vmem:[#allocation2 + $0x48] sm:$0xff] %v722_v59  ;;  %780 = vst [vmem:[#allocation2 + $0x28] sm:$0xff] %v762_v60  ;;  %v717_v63 = vadd.f32 %v2507_v32, %v716_v61  ;;  %v757_v0 = vadd.f32 %v2507_v32, %v756_v62 }
 0x1aa   : > { %771 = vst [vmem:[#allocation2 + $0x8] sm:$0xff] %v717_v63  ;;  %779 = vst [vmem:[#allocation2 + $0x78] sm:$0xff] %v757_v0 }
 0x1ab PF: > { %p797_p11 = scmp.lt.s32.totalorder %s3641_s14, 1  ;;  %v3884_v3 = vld [vmem:[%s572_s21] ss:$0 sm:$0xff]  ;;  %v794_v8 = vld [vmem:[#allocation2 + $0x70] sm:$0xff]  ;;  %v792_v12 = vld [vmem:[#allocation2 + $0x38] sm:$0xff]  ;;  %p2583_p13 = scmp.ne.s32.totalorder %s3641_s14, 3 }
 0x1ac   : > { %v3889_v6 = vld [vmem:[%s3837_s15] ss:$0 sm:$0xff]  ;;  %v820_v10 = vmul.f32 %v3884_v3, %v794_v8  ;;  %v791_v11 = vld [vmem:[#allocation2 + $0x10] sm:$0xff]  ;;  %v818_v17 = vmul.f32 %v3884_v3, %v792_v12  ;;  %v3069_v31 = vld [vmem:[#allocation10] sm:$0xff]  }
 0x1ad   : > { %v793_v7 = vld [vmem:[#allocation2 + $0x60] sm:$0xff]  ;;  %s798_s22 = scalar_select %p797_p11, %s3641_s14, 1  ;;  %v817_v16 = vmul.f32 %v3884_v3, %v791_v11  ;;  %2792 = vmatprep.mubr.bf16.mxu0 %v3069_v31  ;;  %v785_v58 = vld [vmem:[#allocation2 + $0x50] sm:$0xff]  ;;  %v786_v59 = vld [vmem:[#allocation2 + $0x68] sm:$0xff] }
 0x1ae   : > { %v819_v9 = vmul.f32 %v3884_v3, %v793_v7  ;;  %v789_v13 = vld [vmem:[#allocation2 + $0x40] sm:$0xff]  ;;  %v843_v20 = vadd.f32 %v3889_v6, %v820_v10  ;;  %v841_v26 = vadd.f32 %v3889_v6, %v818_v17  ;;  %v783_v0 = vld [vmem:[#allocation2 + $0x58] sm:$0xff] }
 0x1af   : > { %v796_v2 = vld [vmem:[#allocation2 + $0x28] sm:$0xff]  ;;  %v790_v18 = vld [vmem:[#allocation2 + $0x20] sm:$0xff]  ;;  %s799_s28 = scvt.s32.f32 %s798_s22  ;;  %v815_v21 = vmul.f32 %v3884_v3, %v789_v13  ;;  %v840_v25 = vadd.f32 %v3889_v6, %v817_v16 }
 0x1b0   : > { %v822_v5 = vmul.f32 %v3884_v3, %v796_v2  ;;  %v842_v19 = vadd.f32 %v3889_v6, %v819_v9  ;;  %v816_v22 = vmul.f32 %v3884_v3, %v790_v18  ;;  %v859_v29 = vmax.f32 %v843_v20, 0.0  ;;  %v788_v53 = vld [vmem:[#allocation2 + $0x48] sm:$0xff] }
 0x1b1   : > { %v795_v1 = vld [vmem:[#allocation2 + $0x78] sm:$0xff]  ;;  %v3904_v27 = vstv %s799_s28  ;;  %s879_s25 = ssub.f32 1.0, %s799_s28  ;;  %v838_v30 = vadd.f32 %v3889_v6, %v815_v21  ;;  %v856_v34 = vmax.f32 %v840_v25, 0.0  ;;  %v857_v35 = vmax.f32 %v841_v26, 0.0  ;;  %v787_v48 = vld [vmem:[#allocation2 + $0x8] sm:$0xff] }
 0x1b2   : > { %v821_v4 = vmul.f32 %v3884_v3, %v795_v1  ;;  %v845_v15 = vadd.f32 %v3889_v6, %v822_v5  ;;  %4463 = vst [vmem:[#allocation27_spill] sm:$0xff] %v3904_v27  ;;  %v858_v28 = vmax.f32 %v842_v19, 0.0  ;;  %v876_v38 = vmul.f32 %v3904_v27, %v859_v29  ;;  %v784_v5 = vld [vmem:[#allocation2 + $0x18] sm:$0xff] }
 0x1b3   : > { %v3909_v36 = vstv %s879_s25  ;;  %v839_v39 = vadd.f32 %v3889_v6, %v816_v22  ;;  %v873_v44 = vmul.f32 %v3904_v27, %v856_v34  ;;  %v874_v45 = vmul.f32 %v3904_v27, %v857_v35 }
 0x1b4   : > { %v844_v14 = vadd.f32 %v3889_v6, %v821_v4  ;;  %v861_v24 = vmax.f32 %v845_v15, 0.0  ;;  %v875_v37 = vmul.f32 %v3904_v27, %v858_v28  ;;  %v895_v40 = vmul.f32 %v3909_v36, %v795_v1 }
 0x1b5   : > { %v896_v41 = vmul.f32 %v3909_v36, %v796_v2  ;;  %v893_v42 = vmul.f32 %v3909_v36, %v793_v7  ;;  %v894_v43 = vmul.f32 %v3909_v36, %v794_v8  ;;  %v891_v46 = vmul.f32 %v3909_v36, %v791_v11 }
 0x1b6   : > { %v860_v23 = vmax.f32 %v844_v14, 0.0  ;;  %v878_v33 = vmul.f32 %v3904_v27, %v861_v24  ;;  %v892_v47 = vmul.f32 %v3909_v36, %v792_v12  ;;  %v854_v56 = vmax.f32 %v838_v30, 0.0  ;;  %v781_v14 = vld [vmem:[#allocation2 + $0x30] sm:$0xff] }
 0x1b7   : > { %v3926_v51 = vadd.f32 %v893_v42, %v875_v37  ;;  %v3928_v52 = vadd.f32 %v894_v43, %v876_v38  ;;  %v3930_v54 = vadd.f32 %v891_v46, %v873_v44  ;;  %v855_v57 = vmax.f32 %v839_v39, 0.0 }
 0x1b8   : > { %v877_v32 = vmul.f32 %v3904_v27, %v860_v23  ;;  %v3924_v50 = vadd.f32 %v896_v41, %v878_v33  ;;  %v3932_v55 = vadd.f32 %v892_v47, %v874_v45  ;;  %v889_v62 = vmul.f32 %v3909_v36, %v789_v13  ;;  %v782_v23 = vld [vmem:[#allocation2] sm:$0xff] }
 0x1b9   : > { %4466 = vst [vmem:[#allocation30_spill] sm:$0xff] %v3926_v51  ;;  %4467 = vst [vmem:[#allocation31_spill] sm:$0xff] %v3928_v52  ;;  %v935_v61 = vpack.c.bf16 %v3928_v52, %v3926_v51  ;;  %v890_v63 = vmul.f32 %v3909_v36, %v790_v18  ;;  %v871_v1 = vmul.f32 %v3904_v27, %v854_v56 }
 0x1ba   : > { %v3922_v49 = vadd.f32 %v895_v40, %v877_v32  ;;  %4465 = vst [vmem:[#allocation29_spill] sm:$0xff] %v3924_v50  ;;  %4468 = vst [vmem:[#allocation32_spill] sm:$0xff] %v3930_v54  ;;  %v872_v2 = vmul.f32 %v3904_v27, %v855_v57  ;;  %v813_v4 = vmul.f32 %v3884_v3, %v787_v48 }
 0x1bb   : > { %4469 = vst [vmem:[#allocation33_spill] sm:$0xff] %v3932_v55  ;;  %v934_v7 = vpack.c.bf16 %v3932_v55, %v3930_v54  ;;  %v814_v8 = vmul.f32 %v3884_v3, %v788_v53  ;;  %v811_v9 = vmul.f32 %v3884_v3, %v785_v58  ;;  %v3947_v10 = vadd.f32 %v889_v62, %v871_v1 }
 0x1bc   : > { %4464 = vst [vmem:[#allocation28_spill] sm:$0xff] %v3922_v49  ;;  %v936_v60 = vpack.c.bf16 %v3924_v50, %v3922_v49  ;;  %v3949_v11 = vadd.f32 %v890_v63, %v872_v2  ;;  %v836_v12 = vadd.f32 %v3889_v6, %v813_v4  ;;  %v812_v13 = vmul.f32 %v3884_v3, %v786_v59 }
 0x1bd   : > { %4470 = vst [vmem:[#allocation34_spill] sm:$0xff] %v3947_v10  ;;  %v837_v15 = vadd.f32 %v3889_v6, %v814_v8  ;;  %v887_v16 = vmul.f32 %v3909_v36, %v787_v48  ;;  %v888_v17 = vmul.f32 %v3909_v36, %v788_v53  ;;  %v834_v18 = vadd.f32 %v3889_v6, %v811_v9  ;;  %v3071_v8 = vld [vmem:[#allocation10 + $0x10] sm:$0xff]   ;;  %v3072_v9 = vld [vmem:[#allocation10 + $0x18] sm:$0xff]  }
 0x1be   : > { %2776 = vmatprep.subr.bf16.mxu0 %v936_v60  ;;  %4471 = vst [vmem:[#allocation35_spill] sm:$0xff] %v3949_v11  ;;  %v852_v19 = vmax.f32 %v836_v12, 0.0  ;;  %v835_v20 = vadd.f32 %v3889_v6, %v812_v13  ;;  %v885_v21 = vmul.f32 %v3909_v36, %v785_v58  ;;  %v809_v22 = vmul.f32 %v3884_v3, %v783_v0  ;;  %v3073_v12 = vld [vmem:[#allocation10 + $0x20] sm:$0xff]   ;;  %v3074_v13 = vld [vmem:[#allocation10 + $0x28] sm:$0xff]  }
 0x1bf   : > { %2777 = vmatpush3.bf16.msra.mxu0 %v936_v60  ;;  %v853_v24 = vmax.f32 %v837_v15, 0.0  ;;  %v850_v25 = vmax.f32 %v834_v18, 0.0  ;;  %v886_v26 = vmul.f32 %v3909_v36, %v786_v59  ;;  %v810_v28 = vmul.f32 %v3884_v3, %v784_v5  ;;  %v3076_v15 = vld [vmem:[#allocation10 + $0x38] sm:$0xff]  }
 0x1c0   : > { %2778 = vmatprep.subr.bf16.mxu0 %v935_v61  ;;  %v933_v29 = vpack.c.bf16 %v3949_v11, %v3947_v10  ;;  %v869_v30 = vmul.f32 %v3904_v27, %v852_v19  ;;  %v851_v31 = vmax.f32 %v835_v20, 0.0  ;;  %v832_v32 = vadd.f32 %v3889_v6, %v809_v22 }
 0x1c1   : > { %v870_v33 = vmul.f32 %v3904_v27, %v853_v24  ;;  %v867_v34 = vmul.f32 %v3904_v27, %v850_v25  ;;  %v833_v35 = vadd.f32 %v3889_v6, %v810_v28  ;;  %v807_v37 = vmul.f32 %v3884_v3, %v781_v14 }
 0x1c2   : > { %v3970_v38 = vadd.f32 %v887_v16, %v869_v30  ;;  %v868_v39 = vmul.f32 %v3904_v27, %v851_v31  ;;  %v848_v40 = vmax.f32 %v832_v32, 0.0  ;;  %v808_v41 = vmul.f32 %v3884_v3, %v782_v23 }
 0x1c3   : > { %2779 = vmatpush3.bf16.msra.mxu0 %v935_v61  ;;  %v3974_v42 = vadd.f32 %v888_v17, %v870_v33  ;;  %v849_v43 = vmax.f32 %v833_v35, 0.0  ;;  %v883_v44 = vmul.f32 %v3909_v36, %v783_v0  ;;  %v830_v45 = vadd.f32 %v3889_v6, %v807_v37 }
 0x1c4   : > { %2780 = vmatprep.subr.bf16.mxu0 %v934_v7  ;;  %v3978_v46 = vadd.f32 %v885_v21, %v867_v34  ;;  %v3980_v47 = vadd.f32 %v886_v26, %v868_v39  ;;  %v884_v48 = vmul.f32 %v3909_v36, %v784_v5  ;;  %v831_v53 = vadd.f32 %v3889_v6, %v808_v41 }
 0x1c5   : > { %v932_v3 = vpack.c.bf16 %v3974_v42, %v3970_v38  ;;  %v865_v56 = vmul.f32 %v3904_v27, %v848_v40  ;;  %v866_v57 = vmul.f32 %v3904_v27, %v849_v43  ;;  %v846_v58 = vmax.f32 %v830_v45, 0.0 }
 0x1c6   : > { %v847_v59 = vmax.f32 %v831_v53, 0.0  ;;  %v931_v60 = vpack.c.bf16 %v3980_v47, %v3978_v46  ;;  %v881_v61 = vmul.f32 %v3909_v36, %v781_v14  ;;  %v882_v62 = vmul.f32 %v3909_v36, %v782_v23  ;;  %v3075_v14 = vld [vmem:[#allocation10 + $0x30] sm:$0xff]  }
 0x1c7   : > { %2781 = vmatpush3.bf16.msra.mxu0 %v934_v7  ;;  %v3992_v6 = vadd.f32 %v883_v44, %v865_v56  ;;  %v3994_v63 = vadd.f32 %v884_v48, %v866_v57  ;;  %v863_v0 = vmul.f32 %v3904_v27, %v846_v58  ;;  %v3070_v7 = vld [vmem:[#allocation10 + $0x8] sm:$0xff]   ;;  %v4416_v16 = vmov 0  }
 0x1c8   : > { %2782 = vmatprep.subr.bf16.mxu0 %v933_v29  ;;  %v864_v1 = vmul.f32 %v3904_v27, %v847_v59  ;;  %1567 = vmatprep.mubr.bf16.mxu1 %v4416_v16 }
 0x1c9   : > { %v930_v2 = vpack.c.bf16 %v3994_v63, %v3992_v6  ;;  %v4000_v4 = vadd.f32 %v881_v61, %v863_v0 }
 0x1ca   : > { %v4002_v5 = vadd.f32 %v882_v62, %v864_v1 }
 0x1cb   : > { %2783 = vmatpush3.bf16.msra.mxu0 %v933_v29 }
 0x1cc   : > { %2784 = vmatprep.subr.bf16.mxu0 %v932_v3  ;;  %v929_v36 = vpack.c.bf16 %v4002_v5, %v4000_v4 }
 0x1cf   : > { %2785 = vmatpush3.bf16.msra.mxu0 %v932_v3 }
 0x1d0   : > { %2786 = vmatprep.subr.bf16.mxu0 %v931_v60 }
 0x1d3   : > { %2787 = vmatpush3.bf16.msra.mxu0 %v931_v60 }
 0x1d4   : > { %2788 = vmatprep.subr.bf16.mxu0 %v930_v2 }
 0x1d7   : > { %2789 = vmatpush3.bf16.msra.mxu0 %v930_v2 }
 0x1d8   : > { %2790 = vmatprep.subr.bf16.mxu0 %v929_v36 }
 0x1db   : > { %2791 = vmatpush3.bf16.msra.mxu0 %v929_v36 }
 0x1de   : > { %2793 = vmatmul.mubr.bf16.vlgmr.msra.gmra.mxu0 %v3070_v7 }
 0x1df   : > { %2796 = vmatprep.mubr.bf16.mxu0 %v3071_v8 }
 0x1e6   : > { %2797 = vmatmul.mubr.bf16.gmra.mxu0 %v3072_v9 }
 0x1e7   : > { %2800 = vmatprep.mubr.bf16.mxu0 %v3073_v12 }
 0x1ee   : > { %2801 = vmatmul.mubr.bf16.gmra.mxu0 %v3074_v13 }
 0x1ef   : > { %2804 = vmatprep.mubr.bf16.mxu0 %v3075_v14 }
 0x1f6   : > { %2805 = vmatmul.mubr.bf16.gmra.mxu0 %v3076_v15 }
 0x29e   : > { %v2794_v17 = vpop.f32.mrf.mxu0 }
 0x29f   : > { %v1084_v24 = vmax.f32 %v2794_v17, 0.0 }
 0x2a0   : > { %v1019_v18 = vpop.f32.mrf.mxu0 }
 0x2a1   : > { %v1082_v26 = vmax.f32 %v1019_v18, 0.0  ;;  %v4007_v30 = vadd.f32 1e-07, %v1084_v24 }
 0x2a2   : > { %v2795_v19 = vpop.f32.mrf.mxu0 }
 0x2a3   : > { %v1085_v28 = vmax.f32 %v2795_v19, 0.0  ;;  %v4009_v33 = vadd.f32 1e-07, %v1082_v26  ;;  %v4014_v44 = vmul.f32 0.1, %v4007_v30 }
 0x2a4   : > { %v1022_v20 = vpop.f32.mrf.mxu0 }
 0x2a5   : > { %v4011_v35 = vadd.f32 1e-07, %v1085_v28  ;;  %v1083_v41 = vmax.f32 %v1022_v20, 0.0  ;;  %v4019_v56 = vmul.f32 0.1, %v4009_v33 }
 0x2a6   : > { %v2798_v21 = vpop.f32.mrf.mxu0 }
 0x2a7   : > { %v1088_v31 = vmax.f32 %v2798_v21, 0.0  ;;  %v4024_v59 = vmul.f32 0.1, %v4011_v35  ;;  %v4030_v0 = vadd.f32 1e-07, %v1083_v41 }
 0x2a8   : > { %v1035_v22 = vpop.f32.mrf.mxu0 }
 0x2a9   : > { %v1086_v37 = vmax.f32 %v1035_v22, 0.0  ;;  %v4016_v45 = vadd.f32 1e-07, %v1088_v31 }
 0x2aa   : > { %v2799_v23 = vpop.f32.mrf.mxu0 }
 0x2ab   : > { %v1089_v34 = vmax.f32 %v2799_v23, 0.0  ;;  %v4026_v60 = vadd.f32 1e-07, %v1086_v37  ;;  %v4035_v36 = vmul.f32 0.1, %v4016_v45 }
 0x2ac   : > { %v1038_v25 = vpop.f32.mrf.mxu0  ;;  %v4058_v23 = vmul.f32 0.1, %v4030_v0 }
 0x2ad   : > { %v1087_v39 = vmax.f32 %v1038_v25, 0.0  ;;  %v4021_v57 = vadd.f32 1e-07, %v1089_v34  ;;  %v4047_v15 = vmul.f32 0.1, %v4026_v60  ;;  %v1132_v34 = vmax.f32 %v4014_v44, %v4035_v36 }
 0x2ae   : > { %v2802_v29 = vpop.f32.mrf.mxu0 }
 0x2af   : > { %v1092_v48 = vmax.f32 %v2802_v29, 0.0  ;;  %v4028_v61 = vadd.f32 1e-07, %v1087_v39  ;;  %v4042_v12 = vmul.f32 0.1, %v4021_v57  ;;  %v1130_v37 = vmax.f32 %v4019_v56, %v4047_v15 }
 0x2b0   : > { %v1051_v32 = vpop.f32.mrf.mxu0 }
 0x2b1   : > { %v1090_v53 = vmax.f32 %v1051_v32, 0.0  ;;  %v4037_v7 = vadd.f32 1e-07, %v1092_v48  ;;  %v4050_v17 = vmul.f32 0.1, %v4028_v61  ;;  %v1133_v28 = vmax.f32 %v4024_v59, %v4042_v12 }
 0x2b2   : > { %v2803_v40 = vpop.f32.mrf.mxu0 }
 0x2b3   : > { %v1093_v43 = vmax.f32 %v2803_v40, 0.0  ;;  %v4039_v8 = vadd.f32 1e-07, %v1090_v53  ;;  %v1124_v24 = vmul.f32 0.1, %v4037_v7  ;;  %v1131_v39 = vmax.f32 %v4058_v23, %v4050_v17 }
 0x2b4   : > { %v1054_v3 = vpop.f32.mrf.mxu0 }
 0x2b5   : > { %v1091_v58 = vmax.f32 %v1054_v3, 0.0  ;;  %v4032_v1 = vadd.f32 1e-07, %v1093_v43  ;;  %v1122_v25 = vmul.f32 0.1, %v4039_v8  ;;  %v1136_v3 = vmax.f32 %v1132_v34, %v1124_v24 }
 0x2b6   : > { %v2806_v62 = vpop.f32.mrf.mxu0 }
 0x2b7   : > { %v1096_v2 = vmax.f32 %v2806_v62, 0.0  ;;  %v4044_v13 = vadd.f32 1e-07, %v1091_v58  ;;  %v1125_v20 = vmul.f32 0.1, %v4032_v1  ;;  %v1134_v58 = vmax.f32 %v1130_v37, %v1122_v25 }
 0x2b8   : > { %v1067_v9 = vpop.f32.mrf.mxu0 }
 0x2b9   : > { %v1094_v14 = vmax.f32 %v1067_v9, 0.0  ;;  %v4052_v18 = vadd.f32 1e-07, %v1096_v2  ;;  %v1123_v29 = vmul.f32 0.1, %v4044_v13  ;;  %v1137_v41 = vmax.f32 %v1133_v28, %v1125_v20 }
 0x2ba   : > { %v2807_v19 = vpop.f32.mrf.mxu0 }
 0x2bb   : > { %v4055_v21 = vadd.f32 1e-07, %v1094_v14  ;;  %v1097_v22 = vmax.f32 %v2807_v19, 0.0  ;;  %v1128_v40 = vmul.f32 0.1, %v4052_v18  ;;  %v1135_v62 = vmax.f32 %v1131_v39, %v1123_v29 }
 0x2bc   : > { %v1070_v26 = vpop.f32.mrf.mxu0 }
 0x2bd   : > { %v4065_v31 = vadd.f32 1e-07, %v1097_v22  ;;  %v1095_v32 = vmax.f32 %v1070_v26, 0.0  ;;  %v1126_v43 = vmul.f32 0.1, %v4055_v21  ;;  %v1140_v14 = vmax.f32 %v1136_v3, %v1128_v40 }
 0x2bf   : > { %v1129_v48 = vmul.f32 0.1, %v4065_v31  ;;  %v4076_v53 = vadd.f32 1e-07, %v1095_v32  ;;  %v1138_v19 = vmax.f32 %v1134_v58, %v1126_v43 }
 0x2c1   : > { %v1141_v2 = vmax.f32 %v1137_v41, %v1129_v48  ;;  %v1127_v9 = vmul.f32 0.1, %v4076_v53 }
 0x2c3   : > { %v1139_v22 = vmax.f32 %v1135_v62, %v1127_v9  ;;  %v1143_v26 = vmax.f32 %v1140_v14, %v1141_v2 }
 0x2c5   : > { %v1142_v16 = vmax.f32 %v1138_v19, %v1139_v22 }
 0x2c7   : > { %v1144_v27 = vmax.f32 %v1142_v16, %v1143_v26 }
 0x2c9   : > { %v1145_v50 = vrot.slane %v1144_v27, 4 }
 0x2cb   : > { %v1146_v28 = vmax.f32 %v1144_v27, %v1145_v50 }
 0x2cd   : > { %v1147_v49 = vrot.slane %v1146_v28, 2 }
 0x2cf   : > { %v1148_v52 = vmax.f32 %v1146_v28, %v1147_v49 }
 0x2d1   : > { %v1149_v51 = vrot.slane %v1148_v52, 1 }
 0x2d3   : > { %v1150_v55 = vmax.f32 %v1148_v52, %v1149_v51 }
 0x2d5   : > { %v1164_v32 = vsub.f32 %v1127_v9, %v1150_v55  ;;  %v1165_v54 = vsub.f32 %v1128_v40, %v1150_v55  ;;  %v1166_v34 = vsub.f32 %v1129_v48, %v1150_v55  ;;  %v1163_v37 = vsub.f32 %v1126_v43, %v1150_v55 }
 0x2d6   : > { %v1161_v39 = vsub.f32 %v1124_v24, %v1150_v55  ;;  %v1162_v41 = vsub.f32 %v1125_v20, %v1150_v55  ;;  %v1159_v58 = vsub.f32 %v1122_v25, %v1150_v55  ;;  %v1160_v2 = vsub.f32 %v1123_v29, %v1150_v55 }
 0x2d7   : > { %v1193_v11 = vmul.f32 1.442695, %v1164_v32  ;;  %v1195_v10 = vmul.f32 1.442695, %v1165_v54  ;;  %v1197_v3 = vmul.f32 1.442695, %v1166_v34  ;;  %v1157_v27 = vsub.f32 %v4035_v36, %v1150_v55 }
 0x2d8   : > { %v1191_v62 = vmul.f32 1.442695, %v1163_v37  ;;  %v1187_v16 = vmul.f32 1.442695, %v1161_v39  ;;  %v1189_v49 = vmul.f32 1.442695, %v1162_v41  ;;  %v1158_v50 = vsub.f32 %v4042_v12, %v1150_v55 }
 0x2d9   : > { %3117 = vpow2.f32 %v1193_v11  ;;  %v1183_v51 = vmul.f32 1.442695, %v1159_v58  ;;  %v1155_v52 = vsub.f32 %v4047_v15, %v1150_v55  ;;  %v1185_v20 = vmul.f32 1.442695, %v1160_v2 }
 0x2da   : > { %3119 = vpow2.f32 %v1195_v10  ;;  %v1156_v54 = vsub.f32 %v4050_v17, %v1150_v55  ;;  %v1179_v24 = vmul.f32 1.442695, %v1157_v27  ;;  %v1153_v25 = vsub.f32 %v4014_v44, %v1150_v55 }
 0x2db   : > { %3121 = vpow2.f32 %v1197_v3  ;;  %v1181_v11 = vmul.f32 1.442695, %v1158_v50  ;;  %v1154_v36 = vsub.f32 %v4024_v59, %v1150_v55  ;;  %v1175_v10 = vmul.f32 1.442695, %v1155_v52 }
 0x2dc   : > { %3123 = vpow2.f32 %v1191_v62  ;;  %v1151_v12 = vsub.f32 %v4019_v56, %v1150_v55  ;;  %v1177_v29 = vmul.f32 1.442695, %v1156_v54  ;;  %v1152_v15 = vsub.f32 %v4058_v23, %v1150_v55 }
 0x2dd   : > { %3125 = vpow2.f32 %v1187_v16  ;;  %v1171_v40 = vmul.f32 1.442695, %v1153_v25  ;;  %v1173_v17 = vmul.f32 1.442695, %v1154_v36 }
 0x2de   : > { %3127 = vpow2.f32 %v1189_v49  ;;  %v1167_v43 = vmul.f32 1.442695, %v1151_v12  ;;  %v1169_v44 = vmul.f32 1.442695, %v1152_v15 }
 0x2df   : > { %3129 = vpow2.f32 %v1183_v51 }
 0x2e0   : > { %3131 = vpow2.f32 %v1185_v20 }
 0x2e1   : > { %3133 = vpow2.f32 %v1179_v24 }
 0x2e2   : > { %3135 = vpow2.f32 %v1181_v11 }
 0x2e3   : > { %3137 = vpow2.f32 %v1175_v10 }
 0x2e4   : > { %3139 = vpow2.f32 %v1177_v29 }
 0x2e5   : > { %3141 = vpow2.f32 %v1171_v40 }
 0x2e6   : > { %v3118_v48 = vpop.eup %3117  ;;  %3143 = vpow2.f32 %v1173_v17 }
 0x2e7   : > { %v3120_v59 = vpop.eup %3119  ;;  %v2605_v9 = vpack.c.bf16 %v3118_v48, %v3118_v48  ;;  %v1292_v14 = vmul.f32 %v3118_v48, %v4076_v53  ;;  %3145 = vpow2.f32 %v1167_v43 }
 0x2e8   : > { %v3122_v56 = vpop.eup %3121  ;;  %v2606_v19 = vpack.c.bf16 %v3120_v59, %v3120_v59  ;;  %v1293_v55 = vmul.f32 %v3120_v59, %v4052_v18  ;;  %3147 = vpow2.f32 %v1169_v44 }
 0x2e9   : > { %v3124_v23 = vpop.eup %3123  ;;  %1276 = vst [vmem:[#allocation3 + $0x68] sm:$0xf] %v2605_v9  ;;  %v2621_v22 = vpack.c.bf16 %v1292_v14, %v1292_v14  ;;  %v2607_v26 = vpack.c.bf16 %v3122_v56, %v3122_v56  ;;  %v1294_v28 = vmul.f32 %v3122_v56, %v4065_v31 }
 0x2ea   : > { %v3126_v32 = vpop.eup %3125  ;;  %1277 = vst [vmem:[#allocation3 + $0x70] sm:$0xf] %v2606_v19  ;;  %v2622_v34 = vpack.c.bf16 %v1293_v55, %v1293_v55  ;;  %v2604_v37 = vpack.c.bf16 %v3124_v23, %v3124_v23  ;;  %v1291_v39 = vmul.f32 %v3124_v23, %v4055_v21 }
 0x2eb   : > { %v3128_v41 = vpop.eup %3127  ;;  %1372 = vst [vmem:[#allocation3 + $0x6c] sm:$0xf] %v2621_v22  ;;  %1278 = vst [vmem:[#allocation3 + $0x78] sm:$0xf] %v2607_v26  ;;  %v2623_v53 = vpack.c.bf16 %v1294_v28, %v1294_v28  ;;  %v2602_v3 = vpack.c.bf16 %v3126_v32, %v3126_v32  ;;  %v1289_v18 = vmul.f32 %v3126_v32, %v4037_v7 }
 0x2ec   : > { %v3130_v58 = vpop.eup %3129  ;;  %1373 = vst [vmem:[#allocation3 + $0x74] sm:$0xf] %v2622_v34  ;;  %1275 = vst [vmem:[#allocation3 + $0x60] sm:$0xf] %v2604_v37  ;;  %v2620_v62 = vpack.c.bf16 %v1291_v39, %v1291_v39  ;;  %v2603_v2 = vpack.c.bf16 %v3128_v41, %v3128_v41  ;;  %v1290_v31 = vmul.f32 %v3128_v41, %v4032_v1 }
 0x2ed   : > { %v3132_v16 = vpop.eup %3131  ;;  %1374 = vst [vmem:[#allocation3 + $0x7c] sm:$0xf] %v2623_v53  ;;  %1273 = vst [vmem:[#allocation3 + $0x50] sm:$0xf] %v2602_v3  ;;  %v2618_v27 = vpack.c.bf16 %v1289_v18, %v1289_v18  ;;  %v2600_v49 = vpack.c.bf16 %v3130_v58, %v3130_v58  ;;  %v1287_v21 = vmul.f32 %v3130_v58, %v4039_v8 }
 0x2ee   : > { %v3134_v50 = vpop.eup %3133  ;;  %1371 = vst [vmem:[#allocation3 + $0x64] sm:$0xf] %v2620_v62  ;;  %1274 = vst [vmem:[#allocation3 + $0x58] sm:$0xf] %v2603_v2  ;;  %v2619_v51 = vpack.c.bf16 %v1290_v31, %v1290_v31  ;;  %v2601_v52 = vpack.c.bf16 %v3132_v16, %v3132_v16  ;;  %v1288_v7 = vmul.f32 %v3132_v16, %v4044_v13 }
 0x2ef   : > { %v3136_v20 = vpop.eup %3135  ;;  %1369 = vst [vmem:[#allocation3 + $0x54] sm:$0xf] %v2618_v27  ;;  %1271 = vst [vmem:[#allocation3 + $0x40] sm:$0xf] %v2600_v49  ;;  %v2616_v54 = vpack.c.bf16 %v1287_v21, %v1287_v21  ;;  %v2598_v24 = vpack.c.bf16 %v3134_v50, %v3134_v50  ;;  %v1285_v1 = vmul.f32 %v3134_v50, %v4016_v45  ;;  %v3101_v27 = vld [vmem:[#allocation11] sm:$0xff]   ;;  %v4472_v49 = vmov 0  }
 0x2f0   : > { %v3138_v25 = vpop.eup %3137  ;;  %1370 = vst [vmem:[#allocation3 + $0x5c] sm:$0xf] %v2619_v51  ;;  %1272 = vst [vmem:[#allocation3 + $0x48] sm:$0xf] %v2601_v52  ;;  %v2617_v11 = vpack.c.bf16 %v1288_v7, %v1288_v7  ;;  %v2599_v36 = vpack.c.bf16 %v3136_v20, %v3136_v20  ;;  %v1286_v8 = vmul.f32 %v3136_v20, %v4021_v57  ;;  %v3102_v21 = vld [vmem:[#allocation11 + $0x8] sm:$0xff]   ;;  %v3103_v50 = vld [vmem:[#allocation11 + $0x10] sm:$0xff]  }
 0x2f1   : > { %v3140_v10 = vpop.eup %3139  ;;  %1367 = vst [vmem:[#allocation3 + $0x44] sm:$0xf] %v2616_v54  ;;  %1269 = vst [vmem:[#allocation3 + $0x30] sm:$0xf] %v2598_v24  ;;  %v2614_v12 = vpack.c.bf16 %v1285_v1, %v1285_v1  ;;  %v2596_v29 = vpack.c.bf16 %v3138_v25, %v3138_v25  ;;  %v1283_v13 = vmul.f32 %v3138_v25, %v4026_v60  ;;  %v3104_v51 = vld [vmem:[#allocation11 + $0x18] sm:$0xff]   ;;  %v3105_v52 = vld [vmem:[#allocation11 + $0x20] sm:$0xff]  }
 0x2f2   : > { %v3142_v15 = vpop.eup %3141  ;;  %1368 = vst [vmem:[#allocation3 + $0x4c] sm:$0xf] %v2617_v11  ;;  %1270 = vst [vmem:[#allocation3 + $0x38] sm:$0xf] %v2599_v36  ;;  %v2615_v40 = vpack.c.bf16 %v1286_v8, %v1286_v8  ;;  %v2597_v17 = vpack.c.bf16 %v3140_v10, %v3140_v10  ;;  %v1284_v45 = vmul.f32 %v3140_v10, %v4028_v61  ;;  %v3079_v14 = vld [vmem:[#allocation3 + $0x70] ss:$8 sps:$4 sm:$0xff]  }
 0x2f3   : > { %v3144_v43 = vpop.eup %3143  ;;  %1365 = vst [vmem:[#allocation3 + $0x34] sm:$0xf] %v2614_v12  ;;  %1267 = vst [vmem:[#allocation3 + $0x20] sm:$0xf] %v2596_v29  ;;  %v2612_v44 = vpack.c.bf16 %v1283_v13, %v1283_v13  ;;  %v2594_v48 = vpack.c.bf16 %v3142_v15, %v3142_v15  ;;  %v1281_v57 = vmul.f32 %v3142_v15, %v4007_v30  ;;  %v3082_v37 = vld [vmem:[#allocation3 + $0x60] ss:$8 sps:$4 sm:$0xff]  }
 0x2f4   : > { %v3146_v59 = vpop.eup %3145  ;;  %v3077_v9 = vld [vmem:[#allocation3 + $0x74] ss:$8 sps:$4 sm:$0xff]   ;;  %1366 = vst [vmem:[#allocation3 + $0x3c] sm:$0xf] %v2615_v40  ;;  %1268 = vst [vmem:[#allocation3 + $0x28] sm:$0xf] %v2597_v17  ;;  %v2613_v60 = vpack.c.bf16 %v1284_v45, %v1284_v45  ;;  %v2595_v56 = vpack.c.bf16 %v3144_v43, %v3144_v43  ;;  %v1282_v19 = vmul.f32 %v3144_v43, %v4011_v35 }
 0x2f5   : > { %v3148_v55 = vpop.eup %3147  ;;  %1363 = vst [vmem:[#allocation3 + $0x24] sm:$0xf] %v2612_v44  ;;  %1265 = vst [vmem:[#allocation3 + $0x10] sm:$0xf] %v2594_v48  ;;  %v2610_v61 = vpack.c.bf16 %v1281_v57, %v1281_v57  ;;  %v2592_v23 = vpack.c.bf16 %v3146_v59, %v3146_v59  ;;  %v1279_v22 = vmul.f32 %v3146_v59, %v4009_v33  ;;  %1535 = vmatprep.subr.bf16.mxu1 %v3077_v9  ;;  %v3080_v26 = vld [vmem:[#allocation3 + $0x64] ss:$8 sps:$4 sm:$0xff]  }
 0x2f6   : > { %1364 = vst [vmem:[#allocation3 + $0x2c] sm:$0xf] %v2613_v60  ;;  %1266 = vst [vmem:[#allocation3 + $0x18] sm:$0xf] %v2595_v56  ;;  %v2611_v30 = vpack.c.bf16 %v1282_v19, %v1282_v19  ;;  %v2593_v28 = vpack.c.bf16 %v3148_v55, %v3148_v55  ;;  %v1280_v32 = vmul.f32 %v3148_v55, %v4030_v0  ;;  %1536 = vmatpush1.bf16.msra.mxu1 %v3079_v14  ;;  %v3085_v33 = vld [vmem:[#allocation3 + $0x50] ss:$8 sps:$4 sm:$0xff]  }
 0x2f7   : > { %1361 = vst [vmem:[#allocation3 + $0x14] sm:$0xf] %v2610_v61  ;;  %1263 = vst [vmem:[#allocation3] sm:$0xf] %v2592_v23  ;;  %v2608_v34 = vpack.c.bf16 %v1279_v22, %v1279_v22  ;;  %1537 = vmatprep.subr.bf16.mxu1 %v3080_v26  ;;  %v3083_v39 = vld [vmem:[#allocation3 + $0x54] ss:$8 sps:$4 sm:$0xff]  }
 0x2f8   : > { %1362 = vst [vmem:[#allocation3 + $0x1c] sm:$0xf] %v2611_v30  ;;  %1264 = vst [vmem:[#allocation3 + $0x8] sm:$0xf] %v2593_v28  ;;  %v2609_v35 = vpack.c.bf16 %v1280_v32, %v1280_v32  ;;  %v3088_v53 = vld [vmem:[#allocation3 + $0x40] ss:$8 sps:$4 sm:$0xff]  }
 0x2f9   : > { %1359 = vst [vmem:[#allocation3 + $0x4] sm:$0xf] %v2608_v34  ;;  %v3086_v41 = vld [vmem:[#allocation3 + $0x44] ss:$8 sps:$4 sm:$0xff]   ;;  %v3091_v3 = vld [vmem:[#allocation3 + $0x30] ss:$8 sps:$4 sm:$0xff]  }
 0x2fa   : > { %1360 = vst [vmem:[#allocation3 + $0xc] sm:$0xf] %v2609_v35  ;;  %1538 = vmatpush1.bf16.msra.mxu1 %v3082_v37  ;;  %v3106_v7 = vld [vmem:[#allocation11 + $0x28] sm:$0xff]   ;;  %v3107_v20 = vld [vmem:[#allocation11 + $0x30] sm:$0xff]   ;;  %v3108_v54 = vld [vmem:[#allocation11 + $0x38] sm:$0xff]  }
 0x2fb   : > { %1539 = vmatprep.subr.bf16.mxu1 %v3083_v39  ;;  %v3089_v0 = vld [vmem:[#allocation3 + $0x34] ss:$8 sps:$4 sm:$0xff]   ;;  %v3094_v58 = vld [vmem:[#allocation3 + $0x20] ss:$8 sps:$4 sm:$0xff]  }
 0x2fc   : > { %v3109_v24 = vld [vmem:[%s3851_s5 + $0x38] sm:$0xff]   ;;  %v3110_v1 = vld [vmem:[%s3851_s5 + $0x30] sm:$0xff]   ;;  %v3111_v25 = vld [vmem:[%s3851_s5 + $0x28] sm:$0xff]  }
 0x2fd   : > { %v3092_v18 = vld [vmem:[#allocation3 + $0x24] ss:$8 sps:$4 sm:$0xff]   ;;  %v3097_v2 = vld [vmem:[#allocation3 + $0x10] ss:$8 sps:$4 sm:$0xff]   ;;  %2808 = vmatprep.subr.bf16.mxu0 %v3109_v24 }
 0x2fe   : > { %1540 = vmatpush1.bf16.msra.mxu1 %v3085_v33  ;;  %2809 = vmatpush3.bf16.msra.mxu0 %v3109_v24  ;;  %v3112_v11 = vld [vmem:[%s3851_s5 + $0x20] sm:$0xff]   ;;  %v3113_v36 = vld [vmem:[%s3851_s5 + $0x18] sm:$0xff]   ;;  %v3114_v8 = vld [vmem:[%s3851_s5 + $0x10] sm:$0xff]  }
 0x2ff   : > { %1541 = vmatprep.subr.bf16.mxu1 %v3086_v41  ;;  %v3095_v62 = vld [vmem:[#allocation3 + $0x14] ss:$8 sps:$4 sm:$0xff]   ;;  %v3100_v16 = vld [vmem:[#allocation3] ss:$8 sps:$4 sm:$0xff]   ;;  %2810 = vmatprep.subr.bf16.mxu0 %v3110_v1 }
 0x300   : > { %v3115_v10 = vld [vmem:[%s3851_s5 + $0x8] sm:$0xff]   ;;  %v3116_v12 = vld [vmem:[%s3851_s5] sm:$0xff]  }
 0x301   : > { %v3098_v31 = vld [vmem:[#allocation3 + $0x4] ss:$8 sps:$4 sm:$0xff]  }
 0x302   : > { %1542 = vmatpush1.bf16.msra.mxu1 %v3088_v53  ;;  %2811 = vmatpush3.bf16.msra.mxu0 %v3110_v1 }
 0x303   : > { %1543 = vmatprep.subr.bf16.mxu1 %v3089_v0  ;;  %2812 = vmatprep.subr.bf16.mxu0 %v3111_v25 }
 0x306   : > { %1544 = vmatpush1.bf16.msra.mxu1 %v3091_v3  ;;  %2813 = vmatpush3.bf16.msra.mxu0 %v3111_v25 }
 0x307   : > { %1545 = vmatprep.subr.bf16.mxu1 %v3092_v18  ;;  %2814 = vmatprep.subr.bf16.mxu0 %v3112_v11 }
 0x30a   : > { %1546 = vmatpush1.bf16.msra.mxu1 %v3094_v58  ;;  %2815 = vmatpush3.bf16.msra.mxu0 %v3112_v11 }
 0x30b   : > { %1547 = vmatprep.subr.bf16.mxu1 %v3095_v62  ;;  %2816 = vmatprep.subr.bf16.mxu0 %v3113_v36 }
 0x30e   : > { %1548 = vmatpush1.bf16.msra.mxu1 %v3097_v2  ;;  %2817 = vmatpush3.bf16.msra.mxu0 %v3113_v36 }
 0x30f   : > { %1549 = vmatprep.subr.bf16.mxu1 %v3098_v31  ;;  %2818 = vmatprep.subr.bf16.mxu0 %v3114_v8 }
 0x312   : > { %1550 = vmatpush1.bf16.msra.mxu1 %v3100_v16  ;;  %2819 = vmatpush3.bf16.msra.mxu0 %v3114_v8 }
 0x313   : > { %2820 = vmatprep.subr.bf16.mxu0 %v3115_v10 }
 0x315   : > { %1568 = vmatmul.mubr.bf16.vlgmr.msra.gmra.mxu1 %v3101_v27 }
 0x316   : > { %1577 = vmatprep.mubr.bf16.mxu1 %v4472_v49  ;;  %2821 = vmatpush3.bf16.msra.mxu0 %v3115_v10 }
 0x317   : > { %2822 = vmatprep.subr.bf16.mxu0 %v3116_v12 }
 0x31a   : > { %2823 = vmatpush3.bf16.msra.mxu0 %v3116_v12 }
 0x31d   : > { %1578 = vmatmul.mubr.bf16.gmra.mxu1 %v3102_v21 }
 0x31e   : > { %1587 = vmatprep.mubr.bf16.mxu1 %v4472_v49 }
 0x325   : > { %1588 = vmatmul.mubr.bf16.gmra.mxu1 %v3103_v50 }
 0x326   : > { %1597 = vmatprep.mubr.bf16.mxu1 %v4472_v49 }
 0x32d   : > { %1598 = vmatmul.mubr.bf16.gmra.mxu1 %v3104_v51 }
 0x32e   : > { %1607 = vmatprep.mubr.bf16.mxu1 %v4472_v49 }
 0x335   : > { %1608 = vmatmul.mubr.bf16.gmra.mxu1 %v3105_v52 }
 0x336   : > { %1617 = vmatprep.mubr.bf16.mxu1 %v4472_v49 }
 0x33d   : > { %1618 = vmatmul.mubr.bf16.gmra.mxu1 %v3106_v7 }
 0x33e   : > { %1627 = vmatprep.mubr.bf16.mxu1 %v4472_v49 }
 0x345   : > { %1628 = vmatmul.mubr.bf16.gmra.mxu1 %v3107_v20 }
 0x346   : > { %1637 = vmatprep.mubr.bf16.mxu1 %v4472_v49 }
 0x34d   : > { %1638 = vmatmul.mubr.bf16.gmra.mxu1 %v3108_v54 }
 0x3d5   : > { %v1569_v29 = vpop.f32.mrf.mxu1 }
 0x3d6   : > { %v1648_v13 = vmax.f32 %v1569_v29, 1e-16 }
 0x3d7   : > { %v1571_v15 = vpop.f32.mrf.mxu1 }
 0x3d8   : > { %3149 = vrcp.f32 %v1648_v13 }
 0x3d9   : > { %v1573_v40 = vpop.f32.mrf.mxu1 }
 0x3da   : > { %v1649_v17 = vmax.f32 %v1573_v40, 1e-16 }
 0x3db   : > { %v1575_v45 = vpop.f32.mrf.mxu1 }
 0x3dc   : > { %3151 = vrcp.f32 %v1649_v17 }
 0x3dd   : > { %v1579_v43 = vpop.f32.mrf.mxu1 }
 0x3de   : > { %v1650_v44 = vmax.f32 %v1579_v43, 1e-16 }
 0x3df   : > { %v1581_v48 = vpop.f32.mrf.mxu1 }
 0x3e0   : > { %3153 = vrcp.f32 %v1650_v44 }
 0x3e1   : > { %v1583_v57 = vpop.f32.mrf.mxu1 }
 0x3e2   : > { %v1651_v59 = vmax.f32 %v1583_v57, 1e-16 }
 0x3e3   : > { %v1585_v9 = vpop.f32.mrf.mxu1 }
 0x3e4   : > { %3155 = vrcp.f32 %v1651_v59 }
 0x3e5   : > { %v3150_v14 = vpop.eup %3149  ;;  %v1589_v60 = vpop.f32.mrf.mxu1 }
 0x3e6   : > { %v1652_v56 = vmax.f32 %v1589_v60, 1e-16  ;;  %v1680_v55 = vmul.f32 %v3150_v14, %v1571_v15  ;;  %v4473_v14 = vld [vmem:[#allocation34_spill] sm:$0xff] }
 0x3e7   : > { %v1591_v19 = vpop.f32.mrf.mxu1 }
 0x3e8   : > { %3157 = vrcp.f32 %v1652_v56  ;;  %v1696_v28 = vadd.f32 %v1680_v55, %v4000_v4  ;;  %v4474_v56 = vld [vmem:[#allocation35_spill] sm:$0xff] }
 0x3e9   : > { %v3152_v61 = vpop.eup %3151  ;;  %v1593_v23 = vpop.f32.mrf.mxu1 }
 0x3ea   : > { %v1681_v22 = vmul.f32 %v3152_v61, %v1575_v45  ;;  %v1653_v26 = vmax.f32 %v1593_v23, 1e-16 }
 0x3eb   : > { %v1595_v30 = vpop.f32.mrf.mxu1 }
 0x3ec   : > { %v1697_v32 = vadd.f32 %v1681_v22, %v4002_v5  ;;  %3159 = vrcp.f32 %v1653_v26 }
 0x3ed   : > { %v3154_v34 = vpop.eup %3153  ;;  %v1599_v35 = vpop.f32.mrf.mxu1 }
 0x3ee   : > { %v1654_v37 = vmax.f32 %v1599_v35, 1e-16  ;;  %v1712_v39 = vpack.c.bf16 %v1697_v32, %v1696_v28  ;;  %v1682_v41 = vmul.f32 %v3154_v34, %v1581_v48  ;;  %v4475_v34 = vld [vmem:[#allocation32_spill] sm:$0xff] }
 0x3ef   : > { %v1601_v33 = vpop.f32.mrf.mxu1 }
 0x3f0   : > { %3161 = vrcp.f32 %v1654_v37  ;;  %2824 = vmatprep.mubr.bf16.mxu0 %v1712_v39  ;;  %v1698_v62 = vadd.f32 %v1682_v41, %v3992_v6  ;;  %v4476_v37 = vld [vmem:[#allocation33_spill] sm:$0xff] }
 0x3f1   : > { %v3156_v53 = vpop.eup %3155  ;;  %v1603_v0 = vpop.f32.mrf.mxu1 }
 0x3f2   : > { %v1683_v3 = vmul.f32 %v3156_v53, %v1585_v9  ;;  %v1655_v18 = vmax.f32 %v1603_v0, 1e-16 }
 0x3f3   : > { %v1605_v58 = vpop.f32.mrf.mxu1 }
 0x3f4   : > { %v1699_v4 = vadd.f32 %v1683_v3, %v3994_v63  ;;  %3163 = vrcp.f32 %v1655_v18  ;;  %v4477_v18 = vld [vmem:[#allocation30_spill] sm:$0xff] }
 0x3f5   : > { %v3158_v5 = vpop.eup %3157  ;;  %v1609_v2 = vpop.f32.mrf.mxu1 }
 0x3f6   : > { %v1713_v31 = vpack.c.bf16 %v1699_v4, %v1698_v62  ;;  %v1656_v16 = vmax.f32 %v1609_v2, 1e-16  ;;  %v1684_v49 = vmul.f32 %v3158_v5, %v1591_v19  ;;  %v4478_v62 = vld [vmem:[#allocation31_spill] sm:$0xff] }
 0x3f7   : > { %v1611_v27 = vpop.f32.mrf.mxu1 }
 0x3f8   : > { %3165 = vrcp.f32 %v1656_v16  ;;  %2825 = vmatmul.mubr.bf16.vlgmr.msra.gmra.mxu0 %v1713_v31  ;;  %v1700_v20 = vadd.f32 %v1684_v49, %v3978_v46 }
 0x3f9   : > { %v3160_v21 = vpop.eup %3159  ;;  %v1613_v50 = vpop.f32.mrf.mxu1 }
 0x3fa   : > { %v1685_v51 = vmul.f32 %v3160_v21, %v1595_v30  ;;  %v1657_v52 = vmax.f32 %v1613_v50, 1e-16  ;;  %v4479_v21 = vld [vmem:[#allocation28_spill] sm:$0xff] }
 0x3fb   : > { %v1615_v7 = vpop.f32.mrf.mxu1 }
 0x3fc   : > { %v1701_v6 = vadd.f32 %v1685_v51, %v3980_v47  ;;  %3167 = vrcp.f32 %v1657_v52  ;;  %v4480_v51 = vld [vmem:[#allocation29_spill] sm:$0xff] }
 0x3fd   : > { %v3162_v63 = vpop.eup %3161  ;;  %v1619_v54 = vpop.f32.mrf.mxu1 }
 0x3fe   : > { %v1658_v24 = vmax.f32 %v1619_v54, 1e-16  ;;  %v1714_v1 = vpack.c.bf16 %v1701_v6, %v1700_v20  ;;  %v1686_v11 = vmul.f32 %v3162_v63, %v1601_v33  ;;  %v4139_v20 = vld [vmem:[%s575_s19] ss:$0 sm:$0xff]  ;;  %v3181_v6 = vld [vmem:[#allocation2 + $0x58] sm:$0xff]  ;;  %v4481_v63 = vld [vmem:[#allocation27_spill] sm:$0xff] }
 0x3ff   : > { %v1621_v25 = vpop.f32.mrf.mxu1  ;;  %v1890_v54 = vmul.f32 %v3181_v6, %v4481_v63 }
 0x400   : > { %3169 = vrcp.f32 %v1658_v24  ;;  %2828 = vmatprep.mubr.bf16.mxu0 %v1714_v1  ;;  %v1702_v13 = vadd.f32 %v1686_v11, %v3970_v38 }
 0x401   : > { %v3164_v36 = vpop.eup %3163  ;;  %v1623_v8 = vpop.f32.mrf.mxu1 }
 0x402   : > { %v1687_v10 = vmul.f32 %v3164_v36, %v1605_v58  ;;  %v1659_v12 = vmax.f32 %v1623_v8, 1e-16 }
 0x403   : > { %v1625_v29 = vpop.f32.mrf.mxu1 }
 0x404   : > { %v1703_v46 = vadd.f32 %v1687_v10, %v3974_v42  ;;  %3171 = vrcp.f32 %v1659_v12  ;;  %v3183_v12 = vld [vmem:[#allocation2 + $0x18] sm:$0xff] }
 0x405   : > { %v3166_v47 = vpop.eup %3165  ;;  %v1629_v15 = vpop.f32.mrf.mxu1 }
 0x406   : > { %v1660_v40 = vmax.f32 %v1629_v15, 1e-16  ;;  %v1715_v17 = vpack.c.bf16 %v1703_v46, %v1702_v13  ;;  %v1688_v43 = vmul.f32 %v3166_v47, %v1611_v27  ;;  %v3184_v15 = vld [vmem:[#allocation2] sm:$0xff] }
 0x407   : > { %v1631_v45 = vpop.f32.mrf.mxu1 }
 0x408   : > { %3173 = vrcp.f32 %v1660_v40  ;;  %2829 = vmatmul.mubr.bf16.gmra.mxu0 %v1715_v17  ;;  %v1704_v60 = vadd.f32 %v1688_v43, %v4473_v14  ;;  %v1889_v40 = vmul.f32 %v3184_v15, %v4481_v63  ;;  %v3186_v14 = vld [vmem:[#allocation2 + $0x50] sm:$0xff] }
 0x409   : > { %v3168_v44 = vpop.eup %3167  ;;  %v1633_v48 = vpop.f32.mrf.mxu1  ;;  %v3196_v15 = vld [vmem:[#allocation2 + $0x70] sm:$0xff] }
 0x40a   : > { %v1689_v57 = vmul.f32 %v3168_v44, %v1615_v7  ;;  %v1661_v59 = vmax.f32 %v1633_v48, 1e-16  ;;  %v3185_v48 = vld [vmem:[#allocation2 + $0x8] sm:$0xff] }
 0x40b   : > { %v1635_v9 = vpop.f32.mrf.mxu1 }
 0x40c   : > { %v1705_v38 = vadd.f32 %v1689_v57, %v4474_v56  ;;  %3175 = vrcp.f32 %v1661_v59  ;;  %v1894_v57 = vmul.f32 %v3185_v48, %v4481_v63 }
 0x40d   : > { %v3170_v42 = vpop.eup %3169  ;;  %v1639_v19 = vpop.f32.mrf.mxu1 }
 0x40e   : > { %v1662_v55 = vmax.f32 %v1639_v19, 1e-16  ;;  %v1716_v61 = vpack.c.bf16 %v1705_v38, %v1704_v60  ;;  %v1690_v22 = vmul.f32 %v3170_v42, %v1621_v25  ;;  %v3182_v25 = vld [vmem:[#allocation2 + $0x30] sm:$0xff]  ;;  %v1892_v60 = vmul.f32 %v3186_v14, %v4481_v63  ;;  %v3187_v19 = vld [vmem:[#allocation2 + $0x48] sm:$0xff] }
 0x40f   : > { %v1641_v23 = vpop.f32.mrf.mxu1  ;;  %v1888_v11 = vmul.f32 %v3182_v25, %v4481_v63 }
 0x410   : > { %3177 = vrcp.f32 %v1662_v55  ;;  %2832 = vmatprep.mubr.bf16.mxu0 %v1716_v61  ;;  %v1706_v35 = vadd.f32 %v1690_v22, %v4475_v34  ;;  %v1895_v55 = vmul.f32 %v3187_v19, %v4481_v63 }
 0x411   : > { %v3172_v26 = vpop.eup %3171  ;;  %v1643_v30 = vpop.f32.mrf.mxu1 }
 0x412   : > { %v1691_v28 = vmul.f32 %v3172_v26, %v1625_v29  ;;  %v1663_v32 = vmax.f32 %v1643_v30, 1e-16  ;;  %v1891_v29 = vmul.f32 %v3183_v12, %v4481_v63  ;;  %v3188_v26 = vld [vmem:[#allocation2 + $0x68] sm:$0xff] }
 0x413   : > { %v1645_v27 = vpop.f32.mrf.mxu1  ;;  %v1893_v30 = vmul.f32 %v3188_v26, %v4481_v63 }
 0x414   : > { %v1707_v39 = vadd.f32 %v1691_v28, %v4476_v37  ;;  %3179 = vrcp.f32 %v1663_v32  ;;  %v3189_v37 = vld [vmem:[#allocation2 + $0x10] sm:$0xff] }
 0x415   : > { %v3174_v33 = vpop.eup %3173 }
 0x416   : > { %v1717_v41 = vpack.c.bf16 %v1707_v39, %v1706_v35  ;;  %v1692_v53 = vmul.f32 %v3174_v33, %v1631_v45  ;;  %v1898_v39 = vmul.f32 %v3189_v37, %v4481_v63 }
 0x418   : > { %2833 = vmatmul.mubr.bf16.gmra.mxu0 %v1717_v41  ;;  %v1708_v58 = vadd.f32 %v1692_v53, %v4477_v18  ;;  %v3190_v53 = vld [vmem:[#allocation2 + $0x40] sm:$0xff] }
 0x419   : > { %v3176_v0 = vpop.eup %3175 }
 0x41a   : > { %v1693_v3 = vmul.f32 %v3176_v0, %v1635_v9  ;;  %v1896_v0 = vmul.f32 %v3190_v53, %v4481_v63 }
 0x41c   : > { %v1709_v4 = vadd.f32 %v1693_v3, %v4478_v62  ;;  %v3191_v62 = vld [vmem:[#allocation2 + $0x38] sm:$0xff] }
 0x41d   : > { %v3178_v5 = vpop.eup %3177 }
 0x41e   : > { %v1718_v2 = vpack.c.bf16 %v1709_v4, %v1708_v58  ;;  %v1694_v31 = vmul.f32 %v3178_v5, %v1641_v23  ;;  %v1899_v4 = vmul.f32 %v3191_v62, %v4481_v63 }
 0x420   : > { %2836 = vmatprep.mubr.bf16.mxu0 %v1718_v2  ;;  %v1710_v50 = vadd.f32 %v1694_v31, %v4479_v21 }
 0x421   : > { %v3180_v16 = vpop.eup %3179 }
 0x422   : > { %v1695_v49 = vmul.f32 %v3180_v16, %v1645_v27  ;;  %v3192_v16 = vld [vmem:[#allocation2 + $0x20] sm:$0xff] }
 0x423   : > { %v1897_v27 = vmul.f32 %v3192_v16, %v4481_v63 }
 0x424   : > { %v1711_v52 = vadd.f32 %v1695_v49, %v4480_v51 }
 0x426   : > { %v1719_v7 = vpack.c.bf16 %v1711_v52, %v1710_v50  ;;  %v3193_v52 = vld [vmem:[#allocation2 + $0x78] sm:$0xff] }
 0x428   : > { %2837 = vmatmul.mubr.bf16.gmra.mxu0 %v1719_v7  ;;  %v1902_v7 = vmul.f32 %v3193_v52, %v4481_v63 }
 0x4b8   : > { %v2826_v24 = vpop.f32.mrf.mxu0 }
 0x4b9   : > { %v1834_v1 = vadd.f32 %v2826_v24, %v4139_v20  ;;  %v3194_v24 = vld [vmem:[#allocation2 + $0x60] sm:$0xff] }
 0x4ba   : > { %v1825_v36 = vpop.f32.mrf.mxu0 }
 0x4bb   : > { %v4144_v8 = vadd.f32 %v1890_v54, %v1834_v1  ;;  %v1826_v10 = vadd.f32 %v4139_v20, %v1825_v36  ;;  %v1900_v1 = vmul.f32 %v3194_v24, %v4481_v63 }
 0x4bc   : > { %v2827_v13 = vpop.f32.mrf.mxu0 }
 0x4bd   : > { %1922 = vst [vmem:[#allocation2 + $0x58] sm:$0xff] %v4144_v8  ;;  %v4149_v46 = vadd.f32 %v1888_v11, %v1826_v10  ;;  %v1837_v47 = vadd.f32 %v2827_v13, %v4139_v20  ;;  %v3195_v10 = vld [vmem:[#allocation2 + $0x28] sm:$0xff] }
 0x4be   : > { %v1828_v17 = vpop.f32.mrf.mxu0  ;;  %v1903_v12 = vmul.f32 %v3195_v10, %v4481_v63 }
 0x4bf   : > { %1920 = vst [vmem:[#allocation2 + $0x30] sm:$0xff] %v4149_v46  ;;  %v4154_v45 = vadd.f32 %v1891_v29, %v1837_v47  ;;  %v1829_v43 = vadd.f32 %v4139_v20, %v1828_v17 }
 0x4c1   : > { %1923 = vst [vmem:[#allocation2 + $0x18] sm:$0xff] %v4154_v45  ;;  %v4158_v44 = vadd.f32 %v1889_v40, %v1829_v43  ;;  %v1901_v40 = vmul.f32 %v3196_v15, %v4481_v63 }
 0x4c3   : > { %1921 = vst [vmem:[#allocation2] sm:$0xff] %v4158_v44 }
 0x4c8   : > { %v2830_v59 = vpop.f32.mrf.mxu0 }
 0x4c9   : > { %v1850_v9 = vadd.f32 %v2830_v59, %v4139_v20 }
 0x4ca   : > { %v1841_v56 = vpop.f32.mrf.mxu0 }
 0x4cb   : > { %v4164_v38 = vadd.f32 %v1894_v57, %v1850_v9  ;;  %v1842_v42 = vadd.f32 %v4139_v20, %v1841_v56 }
 0x4cc   : > { %v2831_v61 = vpop.f32.mrf.mxu0 }
 0x4cd   : > { %1926 = vst [vmem:[#allocation2 + $0x8] sm:$0xff] %v4164_v38  ;;  %v4169_v23 = vadd.f32 %v1892_v60, %v1842_v42  ;;  %v1853_v22 = vadd.f32 %v2831_v61, %v4139_v20 }
 0x4ce   : > { %v1844_v28 = vpop.f32.mrf.mxu0 }
 0x4cf   : > { %1924 = vst [vmem:[#allocation2 + $0x50] sm:$0xff] %v4169_v23  ;;  %v4174_v32 = vadd.f32 %v1895_v55, %v1853_v22  ;;  %v1845_v34 = vadd.f32 %v4139_v20, %v1844_v28 }
 0x4d1   : > { %1927 = vst [vmem:[#allocation2 + $0x48] sm:$0xff] %v4174_v32  ;;  %v4178_v35 = vadd.f32 %v1893_v30, %v1845_v34 }
 0x4d3   : > { %1925 = vst [vmem:[#allocation2 + $0x68] sm:$0xff] %v4178_v35 }
 0x4d8   : > { %v2834_v33 = vpop.f32.mrf.mxu0 }
 0x4d9   : > { %v1866_v41 = vadd.f32 %v2834_v33, %v4139_v20 }
 0x4da   : > { %v1857_v3 = vpop.f32.mrf.mxu0 }
 0x4db   : > { %v4184_v18 = vadd.f32 %v1898_v39, %v1866_v41  ;;  %v1858_v58 = vadd.f32 %v4139_v20, %v1857_v3 }
 0x4dc   : > { %v2835_v5 = vpop.f32.mrf.mxu0 }
 0x4dd   : > { %1930 = vst [vmem:[#allocation2 + $0x10] sm:$0xff] %v4184_v18  ;;  %v4189_v2 = vadd.f32 %v1896_v0, %v1858_v58  ;;  %v1869_v31 = vadd.f32 %v2835_v5, %v4139_v20 }
 0x4de   : > { %v1860_v49 = vpop.f32.mrf.mxu0 }
 0x4df   : > { %1928 = vst [vmem:[#allocation2 + $0x40] sm:$0xff] %v4189_v2  ;;  %v4194_v21 = vadd.f32 %v1899_v4, %v1869_v31  ;;  %v1861_v50 = vadd.f32 %v4139_v20, %v1860_v49 }
 0x4e1   : > { %1931 = vst [vmem:[#allocation2 + $0x38] sm:$0xff] %v4194_v21  ;;  %v4198_v51 = vadd.f32 %v1897_v27, %v1861_v50 }
 0x4e3   : > { %1929 = vst [vmem:[#allocation2 + $0x20] sm:$0xff] %v4198_v51 }
 0x4e8   : > { %v2838_v6 = vpop.f32.mrf.mxu0 }
 0x4e9   : > { %v1882_v54 = vadd.f32 %v2838_v6, %v4139_v20 }
 0x4ea   : > { %v1873_v25 = vpop.f32.mrf.mxu0 }
 0x4eb   : > { %v4204_v11 = vadd.f32 %v1902_v7, %v1882_v54  ;;  %v1874_v36 = vadd.f32 %v4139_v20, %v1873_v25 }
 0x4ec   : > { %v2839_v29 = vpop.f32.mrf.mxu0 }
 0x4ed   : > { %1934 = vst [vmem:[#allocation2 + $0x78] sm:$0xff] %v4204_v11  ;;  %v4209_v13 = vadd.f32 %v1900_v1, %v1874_v36  ;;  %v1885_v47 = vadd.f32 %v2839_v29, %v4139_v20 }
 0x4ee   : > { %v1876_v17 = vpop.f32.mrf.mxu0 }
 0x4ef   : > { %1932 = vst [vmem:[#allocation2 + $0x60] sm:$0xff] %v4209_v13  ;;  %v4214_v43 = vadd.f32 %v1903_v12, %v1885_v47  ;;  %v1877_v48 = vadd.f32 %v4139_v20, %v1876_v17  ;;  %1939 = sbr.rel (%p2583_p13) target bundleno = 1843 (0x733), region = 108 }
 0x4f1   : > { %1935 = vst [vmem:[#allocation2 + $0x28] sm:$0xff] %v4214_v43  ;;  %v4218_v57 = vadd.f32 %v1901_v40, %v1877_v48 }
 0x4f3   : > { %1933 = vst [vmem:[#allocation2 + $0x70] sm:$0xff] %v4218_v57 }
 0x4f4   : > { %v2017_v59 = vld [vmem:[#allocation14 + $0x78] sm:$0xff]  ;;  %v2016_v9 = vld [vmem:[#allocation14 + $0x70] sm:$0xff]  ;;  %v2015_v63 = vld [vmem:[#allocation14 + $0x68] sm:$0xff] }
 0x4f5   : > { %2840 = vmatprep.subr.mxu0 %v2017_v59  ;;  %2928 = vmatprep.subr.mxu1 %v2017_v59  ;;  %v2014_v20 = vld [vmem:[#allocation14 + $0x60] sm:$0xff]  ;;  %v2013_v14 = vld [vmem:[#allocation14 + $0x58] sm:$0xff]  ;;  %v2012_v60 = vld [vmem:[#allocation14 + $0x50] sm:$0xff] }
 0x4f6   : > { %2841 = vmatpush3.msra.mxu0 %v2017_v59  ;;  %2944 = vmatpush3.msra.mxu1 %v2017_v59  ;;  %v2011_v56 = vld [vmem:[#allocation14 + $0x48] sm:$0xff]  ;;  %v2010_v42 = vld [vmem:[#allocation14 + $0x40] sm:$0xff]  ;;  %v2009_v19 = vld [vmem:[#allocation14 + $0x38] sm:$0xff] }
 0x4f7   : > { %2842 = vmatprep.subr.mxu0 %v2016_v9  ;;  %2929 = vmatprep.subr.mxu1 %v2016_v9  ;;  %v2008_v55 = vld [vmem:[#allocation14 + $0x30] sm:$0xff]  ;;  %v4225_v61 = vld [vmem:[%s4397_s9] ss:$0 sm:$0xff]  ;;  %v2007_v22 = vld [vmem:[#allocation14 + $0x28] sm:$0xff] }
 0x4f8   : > { %2843 = vmatpush3.msra.mxu0 %v2016_v9  ;;  %2945 = vmatpush3.msra.mxu1 %v2016_v9  ;;  %v2006_v26 = vld [vmem:[#allocation14 + $0x20] sm:$0xff]  ;;  %v1947_v30 = vmul.f32 %v4225_v61, %v4149_v46  ;;  %v4232_v28 = vld [vmem:[%s4398_s10] ss:$0 sm:$0xff]  ;;  %v1955_v34 = vmul.f32 %v4225_v61, %v4189_v2  ;;  %v1948_v37 = vmul.f32 %v4225_v61, %v4158_v44  ;;  %v2004_v53 = vld [vmem:[#allocation14 + $0x10] sm:$0xff] }
 0x4f9   : > { %2844 = vmatprep.subr.mxu0 %v2015_v63  ;;  %2930 = vmatprep.subr.mxu1 %v2015_v63  ;;  %v1956_v39 = vmul.f32 %v4225_v61, %v4198_v51  ;;  %v2005_v33 = vld [vmem:[#allocation14 + $0x18] sm:$0xff]  ;;  %v1949_v46 = vmul.f32 %v4225_v61, %v4144_v8  ;;  %v1957_v41 = vmul.f32 %v4225_v61, %v4184_v18  ;;  %v2003_v62 = vld [vmem:[#allocation14 + $0x8] sm:$0xff]  ;;  %v2002_v31 = vld [vmem:[#allocation14] sm:$0xff] }
 0x4fa   : > { %2845 = vmatpush3.msra.mxu0 %v2015_v63  ;;  %2946 = vmatpush3.msra.mxu1 %v2015_v63  ;;  %v1970_v0 = vadd.f32 %v4232_v28, %v1947_v30  ;;  %v1950_v44 = vmul.f32 %v4225_v61, %v4154_v45  ;;  %v1978_v3 = vadd.f32 %v4232_v28, %v1955_v34  ;;  %v2586_v63 = vld [vmem:[%s4400_s12] ss:$0 sm:$0xff] }
 0x4fb   : > { %2846 = vmatprep.subr.mxu0 %v2014_v20  ;;  %2931 = vmatprep.subr.mxu1 %v2014_v20  ;;  %v1971_v58 = vadd.f32 %v4232_v28, %v1948_v37  ;;  %v1979_v8 = vadd.f32 %v4232_v28, %v1956_v39  ;;  %v1972_v18 = vadd.f32 %v4232_v28, %v1949_v46 }
 0x4fc   : > { %2847 = vmatpush3.msra.mxu0 %v2014_v20  ;;  %2947 = vmatpush3.msra.mxu1 %v2014_v20  ;;  %v1958_v4 = vmul.f32 %v4225_v61, %v4194_v21  ;;  %v1951_v5 = vmul.f32 %v4225_v61, %v4169_v23  ;;  %v1980_v45 = vadd.f32 %v4232_v28, %v1957_v41  ;;  %v1986_v16 = vmax.f32 %v1970_v0, 0.0 }
 0x4fd   : > { %2848 = vmatprep.subr.mxu0 %v2013_v14  ;;  %2932 = vmatprep.subr.mxu1 %v2013_v14  ;;  %v1959_v2 = vmul.f32 %v4225_v61, %v4209_v13  ;;  %v1973_v27 = vadd.f32 %v4232_v28, %v1950_v44  ;;  %v1994_v49 = vmax.f32 %v1978_v3, 0.0  ;;  %v1987_v21 = vmax.f32 %v1971_v58, 0.0 }
 0x4fe   : > { %2849 = vmatpush3.msra.mxu0 %v2013_v14  ;;  %2948 = vmatpush3.msra.mxu1 %v2013_v14  ;;  %v1995_v50 = vmax.f32 %v1979_v8, 0.0  ;;  %v1952_v23 = vmul.f32 %v4225_v61, %v4178_v35  ;;  %v1988_v51 = vmax.f32 %v1972_v18, 0.0  ;;  %v1981_v52 = vadd.f32 %v4232_v28, %v1958_v4 }
 0x4ff   : > { %2850 = vmatprep.subr.mxu0 %v2012_v60  ;;  %2933 = vmatprep.subr.mxu1 %v2012_v60  ;;  %v1974_v7 = vadd.f32 %v4232_v28, %v1951_v5  ;;  %v1960_v6 = vmul.f32 %v4225_v61, %v4218_v57  ;;  %v1996_v54 = vmax.f32 %v1980_v45, 0.0  ;;  %v1982_v24 = vadd.f32 %v4232_v28, %v1959_v2 }
 0x500   : > { %2851 = vmatpush3.msra.mxu0 %v2012_v60  ;;  %2949 = vmatpush3.msra.mxu1 %v2012_v60  ;;  %v1953_v1 = vmul.f32 %v4225_v61, %v4164_v38  ;;  %v1961_v35 = vmul.f32 %v4225_v61, %v4204_v11  ;;  %v1989_v25 = vmax.f32 %v1973_v27, 0.0  ;;  %v1975_v36 = vadd.f32 %v4232_v28, %v1952_v23 }
 0x501   : > { %2852 = vmatprep.subr.mxu0 %v2011_v56  ;;  %2934 = vmatprep.subr.mxu1 %v2011_v56  ;;  %v1997_v10 = vmax.f32 %v1981_v52, 0.0  ;;  %v1983_v12 = vadd.f32 %v4232_v28, %v1960_v6  ;;  %v1954_v29 = vmul.f32 %v4225_v61, %v4174_v32  ;;  %v1962_v38 = vmul.f32 %v4225_v61, %v4214_v43 }
 0x502   : > { %2853 = vmatpush3.msra.mxu0 %v2011_v56  ;;  %2950 = vmatpush3.msra.mxu1 %v2011_v56  ;;  %v1990_v11 = vmax.f32 %v1974_v7, 0.0  ;;  %v1998_v13 = vmax.f32 %v1982_v24, 0.0  ;;  %v1976_v47 = vadd.f32 %v4232_v28, %v1953_v1  ;;  %v1984_v15 = vadd.f32 %v4232_v28, %v1961_v35 }
 0x503   : > { %2854 = vmatprep.subr.mxu0 %v2010_v42  ;;  %2935 = vmatprep.subr.mxu1 %v2010_v42  ;;  %v1991_v40 = vmax.f32 %v1975_v36, 0.0  ;;  %v1999_v17 = vmax.f32 %v1983_v12, 0.0  ;;  %v1977_v48 = vadd.f32 %v4232_v28, %v1954_v29  ;;  %v1985_v57 = vadd.f32 %v4232_v28, %v1962_v38 }
 0x504   : > { %2855 = vmatpush3.msra.mxu0 %v2010_v42  ;;  %2951 = vmatpush3.msra.mxu1 %v2010_v42  ;;  %v1992_v32 = vmax.f32 %v1976_v47, 0.0  ;;  %v2000_v43 = vmax.f32 %v1984_v15, 0.0 }
 0x505   : > { %2856 = vmatprep.subr.mxu0 %v2009_v19  ;;  %2936 = vmatprep.subr.mxu1 %v2009_v19  ;;  %v1993_v59 = vmax.f32 %v1977_v48, 0.0  ;;  %v2001_v9 = vmax.f32 %v1985_v57, 0.0 }
 0x506   : > { %2857 = vmatpush3.msra.mxu0 %v2009_v19  ;;  %2952 = vmatpush3.msra.mxu1 %v2009_v19 }
 0x507   : > { %2858 = vmatprep.subr.mxu0 %v2008_v55  ;;  %2937 = vmatprep.subr.mxu1 %v2008_v55 }
 0x508   : > { %2859 = vmatpush3.msra.mxu0 %v2008_v55  ;;  %2953 = vmatpush3.msra.mxu1 %v2008_v55 }
 0x509   : > { %2860 = vmatprep.subr.mxu0 %v2007_v22  ;;  %2938 = vmatprep.subr.mxu1 %v2007_v22 }
 0x50a   : > { %2861 = vmatpush3.msra.mxu0 %v2007_v22  ;;  %2954 = vmatpush3.msra.mxu1 %v2007_v22 }
 0x50b   : > { %2862 = vmatprep.subr.mxu0 %v2006_v26  ;;  %2939 = vmatprep.subr.mxu1 %v2006_v26 }
 0x50c   : > { %2863 = vmatpush3.msra.mxu0 %v2006_v26  ;;  %2955 = vmatpush3.msra.mxu1 %v2006_v26 }
 0x50d   : > { %2864 = vmatprep.subr.mxu0 %v2005_v33  ;;  %2940 = vmatprep.subr.mxu1 %v2005_v33 }
 0x50e   : > { %2865 = vmatpush3.msra.mxu0 %v2005_v33  ;;  %2956 = vmatpush3.msra.mxu1 %v2005_v33 }
 0x50f   : > { %2866 = vmatprep.subr.mxu0 %v2004_v53  ;;  %2941 = vmatprep.subr.mxu1 %v2004_v53 }
 0x510   : > { %2867 = vmatpush3.msra.mxu0 %v2004_v53  ;;  %2957 = vmatpush3.msra.mxu1 %v2004_v53 }
 0x511   : > { %2868 = vmatprep.subr.mxu0 %v2003_v62  ;;  %2942 = vmatprep.subr.mxu1 %v2003_v62 }
 0x512   : > { %2869 = vmatpush3.msra.mxu0 %v2003_v62  ;;  %2958 = vmatpush3.msra.mxu1 %v2003_v62 }
 0x513   : > { %2870 = vmatprep.subr.mxu0 %v2002_v31  ;;  %2943 = vmatprep.subr.mxu1 %v2002_v31 }
 0x514   : > { %2871 = vmatpush3.msra.mxu0 %v2002_v31  ;;  %2959 = vmatpush3.msra.mxu1 %v2002_v31 }
 0x515   : > { %2872 = vmatprep.mubr.f32.mxu0 %v1986_v16  ;;  %2884 = vmatprep.mubr.f32.mxu1 %v1994_v49 }
 0x516   : > { %2873 = vmatmul.mubr.f32.vlgmr.msra.gmra.mxu0 %v1987_v21  ;;  %2885 = vmatmul.mubr.f32.vlgmr.msra.gmra.mxu1 %v1995_v50 }
 0x517   : > { %2875 = vmatprep.mubr.f32.mxu0 %v1988_v51  ;;  %2887 = vmatprep.mubr.f32.mxu1 %v1996_v54 }
 0x51a   : > { %2876 = vmatmul.mubr.f32.gmra.mxu0 %v1989_v25  ;;  %2888 = vmatmul.mubr.f32.gmra.mxu1 %v1997_v10 }
 0x51b   : > { %2878 = vmatprep.mubr.f32.mxu0 %v1990_v11  ;;  %2890 = vmatprep.mubr.f32.mxu1 %v1998_v13 }
 0x51e   : > { %2879 = vmatmul.mubr.f32.gmra.mxu0 %v1991_v40  ;;  %2891 = vmatmul.mubr.f32.gmra.mxu1 %v1999_v17 }
 0x51f   : > { %2881 = vmatprep.mubr.f32.mxu0 %v1992_v32  ;;  %2893 = vmatprep.mubr.f32.mxu1 %v2000_v43 }
 0x522   : > { %2882 = vmatmul.mubr.f32.gmra.mxu0 %v1993_v59  ;;  %2894 = vmatmul.mubr.f32.gmra.mxu1 %v2001_v9 }
 0x5d6   : > { %v2874_v20 = vpop.f32.mrf.mxu0  ;;  %v2886_v14 = vpop.f32.mrf.mxu1 }
 0x5d7   : > { %v2097_v60 = vadd.f32 %v2874_v20, %v2586_v63  ;;  %v2137_v56 = vadd.f32 %v2886_v14, %v2586_v63 }
 0x5d8   : > { %v2091_v42 = vpop.f32.mrf.mxu0  ;;  %v2131_v19 = vpop.f32.mrf.mxu1 }
 0x5d9   : > { %2188 = vmax.xlane.f32.xlu1 %v2137_v56  ;;  %2172 = vmax.xlane.f32.xlu0 %v2097_v60  ;;  %v2092_v61 = vadd.f32 %v2586_v63, %v2091_v42  ;;  %v2132_v37 = vadd.f32 %v2586_v63, %v2131_v19 }
 0x5da   : > { %v2877_v55 = vpop.f32.mrf.mxu0  ;;  %v2889_v30 = vpop.f32.mrf.mxu1 }
 0x5db   : > { %v2107_v22 = vadd.f32 %v2877_v55, %v2586_v63  ;;  %v2147_v28 = vadd.f32 %v2889_v30, %v2586_v63 }
 0x5dc   : > { %v2101_v26 = vpop.f32.mrf.mxu0  ;;  %v2141_v39 = vpop.f32.mrf.mxu1 }
 0x5dd   : > { %2176 = vmax.xlane.f32.xlu1 %v2107_v22  ;;  %2170 = vmax.xlane.f32.xlu0 %v2092_v61  ;;  %v2102_v41 = vadd.f32 %v2586_v63, %v2101_v26  ;;  %v2142_v53 = vadd.f32 %v2586_v63, %v2141_v39 }
 0x5de   : > { %v2880_v34 = vpop.f32.mrf.mxu0  ;;  %v2892_v46 = vpop.f32.mrf.mxu1 }
 0x5df   : > { %v2117_v0 = vadd.f32 %v2880_v34, %v2586_v63  ;;  %v2157_v8 = vadd.f32 %v2892_v46, %v2586_v63 }
 0x5e0   : > { %v2111_v33 = vpop.f32.mrf.mxu0  ;;  %v2151_v3 = vpop.f32.mrf.mxu1 }
 0x5e1   : > { %2192 = vmax.xlane.f32.xlu1 %v2147_v28  ;;  %2186 = vmax.xlane.f32.xlu0 %v2132_v37  ;;  %v2112_v44 = vadd.f32 %v2586_v63, %v2111_v33  ;;  %v2152_v62 = vadd.f32 %v2586_v63, %v2151_v3 }
 0x5e2   : > { %v2883_v58 = vpop.f32.mrf.mxu0  ;;  %v2895_v4 = vpop.f32.mrf.mxu1 }
 0x5e3   : > { %v4283_v5 = vadd.f32 %v2883_v58, %v2586_v63  ;;  %v4287_v31 = vadd.f32 %v2895_v4, %v2586_v63 }
 0x5e4   : > { %v2121_v18 = vpop.f32.mrf.mxu0  ;;  %v2161_v2 = vpop.f32.mrf.mxu1 }
 0x5e5   : > { %2174 = vmax.xlane.f32.xlu1 %v2102_v41  ;;  %2190 = vmax.xlane.f32.xlu0 %v2142_v53  ;;  %v4285_v45 = vadd.f32 %v2586_v63, %v2121_v18  ;;  %v4291_v16 = vadd.f32 %v2586_v63, %v2161_v2 }
 0x5e9   : > { %2180 = vmax.xlane.f32.xlu1 %v2117_v0  ;;  %2178 = vmax.xlane.f32.xlu0 %v2112_v44 }
 0x5ed   : > { %2196 = vmax.xlane.f32.xlu1 %v2157_v8  ;;  %2194 = vmax.xlane.f32.xlu0 %v2152_v62 }
 0x5f1   : > { %2184 = vmax.xlane.f32.xlu1 %v4283_v5  ;;  %2182 = vmax.xlane.f32.xlu0 %v4285_v45 }
 0x5f5   : > { %2200 = vmax.xlane.f32.xlu1 %v4287_v31  ;;  %2198 = vmax.xlane.f32.xlu0 %v4291_v16 }
 0x662   : > { %v2189_v27 = vpop.xlane.xlu1 %2188  ;;  %v2173_v49 = vpop.xlane.xlu0 %2172 }
 0x663   : > { %v4295_v21 = vsub.f32 %v2137_v56, %v2189_v27  ;;  %v4297_v50 = vsub.f32 %v2097_v60, %v2173_v49 }
 0x665   : > { %v2220_v23 = vmul.f32 1.442695, %v4297_v50  ;;  %v2236_v7 = vmul.f32 1.442695, %v4295_v21 }
 0x666   : > { %v2177_v51 = vpop.xlane.xlu1 %2176  ;;  %v2171_v52 = vpop.xlane.xlu0 %2170 }
 0x667   : > { %v4301_v6 = vsub.f32 %v2107_v22, %v2177_v51  ;;  %v4303_v54 = vsub.f32 %v2092_v61, %v2171_v52  ;;  %3197 = vpow2.f32 %v2220_v23 }
 0x668   : > { %3199 = vpow2.f32 %v2236_v7 }
 0x669   : > { %v2218_v24 = vmul.f32 1.442695, %v4303_v54  ;;  %v2224_v25 = vmul.f32 1.442695, %v4301_v6 }
 0x66a   : > { %v2193_v1 = vpop.xlane.xlu1 %2192  ;;  %v2187_v35 = vpop.xlane.xlu0 %2186 }
 0x66b   : > { %v4307_v36 = vsub.f32 %v2132_v37, %v2187_v35  ;;  %3201 = vpow2.f32 %v2218_v24  ;;  %v4309_v10 = vsub.f32 %v2147_v28, %v2193_v1 }
 0x66c   : > { %3203 = vpow2.f32 %v2224_v25 }
 0x66d   : > { %v2234_v12 = vmul.f32 1.442695, %v4307_v36  ;;  %v2240_v13 = vmul.f32 1.442695, %v4309_v10 }
 0x66e   : > { %v2175_v29 = vpop.xlane.xlu1 %2174  ;;  %v2191_v38 = vpop.xlane.xlu0 %2190 }
 0x66f   : > { %v4312_v11 = vsub.f32 %v2102_v41, %v2175_v29  ;;  %3205 = vpow2.f32 %v2234_v12  ;;  %v4315_v47 = vsub.f32 %v2142_v53, %v2191_v38 }
 0x671   : > { %v2222_v15 = vmul.f32 1.442695, %v4312_v11  ;;  %v2238_v57 = vmul.f32 1.442695, %v4315_v47 }
 0x672   : > { %v2181_v40 = vpop.xlane.xlu1 %2180  ;;  %v2179_v17 = vpop.xlane.xlu0 %2178 }
 0x673   : > { %3207 = vpow2.f32 %v2222_v15  ;;  %v4318_v48 = vsub.f32 %v2117_v0, %v2181_v40  ;;  %v4321_v32 = vsub.f32 %v2112_v44, %v2179_v17 }
 0x674   : > { %3209 = vpow2.f32 %v2240_v13  ;;  %v3198_v43 = vpop.eup %3197 }
 0x675   : > { %v2228_v59 = vmul.f32 1.442695, %v4318_v48  ;;  %2252 = vadd.xlane.f32.xlu1 %v3198_v43  ;;  %v3200_v14 = vpop.eup %3199  ;;  %v2226_v60 = vmul.f32 1.442695, %v4321_v32 }
 0x676   : > { %v2197_v9 = vpop.xlane.xlu1 %2196  ;;  %v2195_v63 = vpop.xlane.xlu0 %2194 }
 0x677   : > { %3211 = vpow2.f32 %v2228_v59  ;;  %v4324_v20 = vsub.f32 %v2157_v8, %v2197_v9  ;;  %v4327_v56 = vsub.f32 %v2152_v62, %v2195_v63 }
 0x678   : > { %3213 = vpow2.f32 %v2238_v57  ;;  %v3202_v42 = vpop.eup %3201 }
 0x679   : > { %v2244_v19 = vmul.f32 1.442695, %v4324_v20  ;;  %2268 = vadd.xlane.f32.xlu1 %v3200_v14  ;;  %2250 = vadd.xlane.f32.xlu0 %v3202_v42  ;;  %v3204_v26 = vpop.eup %3203  ;;  %v2242_v30 = vmul.f32 1.442695, %v4327_v56 }
 0x67a   : > { %v2185_v55 = vpop.xlane.xlu1 %2184  ;;  %v2183_v61 = vpop.xlane.xlu0 %2182 }
 0x67b   : > { %3215 = vpow2.f32 %v2244_v19  ;;  %v4331_v22 = vsub.f32 %v4283_v5, %v2185_v55  ;;  %v4335_v28 = vsub.f32 %v4285_v45, %v2183_v61 }
 0x67c   : > { %3217 = vpow2.f32 %v2226_v60  ;;  %v3206_v34 = vpop.eup %3205 }
 0x67d   : > { %v2232_v37 = vmul.f32 1.442695, %v4331_v22  ;;  %2256 = vadd.xlane.f32.xlu1 %v3204_v26  ;;  %2266 = vadd.xlane.f32.xlu0 %v3206_v34  ;;  %v2230_v53 = vmul.f32 1.442695, %v4335_v28 }
 0x67e   : > { %v2201_v39 = vpop.xlane.xlu1 %2200  ;;  %v2199_v33 = vpop.xlane.xlu0 %2198 }
 0x67f   : > { %3219 = vpow2.f32 %v2232_v37  ;;  %v4339_v46 = vsub.f32 %v4287_v31, %v2201_v39  ;;  %v4343_v0 = vsub.f32 %v4291_v16, %v2199_v33 }
 0x680   : > { %v3208_v41 = vpop.eup %3207  ;;  %3221 = vpow2.f32 %v2242_v30 }
 0x681   : > { %v3210_v44 = vpop.eup %3209  ;;  %v2248_v3 = vmul.f32 1.442695, %v4339_v46  ;;  %2254 = vadd.xlane.f32.xlu0 %v3208_v41  ;;  %v2246_v8 = vmul.f32 1.442695, %v4343_v0 }
 0x682   : > { %2272 = vadd.xlane.f32.xlu1 %v3210_v44 }
 0x683   : > { %3223 = vpow2.f32 %v2248_v3 }
 0x684   : > { %v3212_v58 = vpop.eup %3211  ;;  %3225 = vpow2.f32 %v2230_v53 }
 0x685   : > { %v3214_v62 = vpop.eup %3213  ;;  %3227 = vpow2.f32 %v2246_v8 }
 0x686   : > { %2260 = vadd.xlane.f32.xlu1 %v3212_v58  ;;  %2270 = vadd.xlane.f32.xlu0 %v3214_v62 }
 0x688   : > { %v3216_v18 = vpop.eup %3215 }
 0x689   : > { %v3218_v4 = vpop.eup %3217 }
 0x68a   : > { %2276 = vadd.xlane.f32.xlu1 %v3216_v18  ;;  %2258 = vadd.xlane.f32.xlu0 %v3218_v4 }
 0x68c   : > { %v3220_v5 = vpop.eup %3219 }
 0x68d   : > { %v3222_v45 = vpop.eup %3221 }
 0x68e   : > { %2264 = vadd.xlane.f32.xlu1 %v3220_v5  ;;  %2274 = vadd.xlane.f32.xlu0 %v3222_v45 }
 0x690   : > { %v3224_v2 = vpop.eup %3223 }
 0x691   : > { %v3226_v31 = vpop.eup %3225 }
 0x692   : > { %2280 = vadd.xlane.f32.xlu1 %v3224_v2  ;;  %2262 = vadd.xlane.f32.xlu0 %v3226_v31  ;;  %v3228_v16 = vpop.eup %3227 }
 0x696   : > { %2278 = vadd.xlane.f32.xlu0 %v3228_v16 }
 0x6fe   : > { %v2253_v27 = vpop.xlane.xlu1 %2252 }
 0x6ff   : > { %3229 = vlog2.f32 %v2253_v27 }
 0x702   : > { %v2269_v49 = vpop.xlane.xlu1 %2268  ;;  %v2251_v23 = vpop.xlane.xlu0 %2250 }
 0x703   : > { %3231 = vlog2.f32 %v2269_v49 }
 0x704   : > { %3233 = vlog2.f32 %v2251_v23 }
 0x706   : > { %v2257_v51 = vpop.xlane.xlu1 %2256  ;;  %v2267_v52 = vpop.xlane.xlu0 %2266 }
 0x707   : > { %3235 = vlog2.f32 %v2257_v51 }
 0x708   : > { %3237 = vlog2.f32 %v2267_v52 }
 0x70a   : > { %v2255_v24 = vpop.xlane.xlu0 %2254 }
 0x70b   : > { %v2273_v7 = vpop.xlane.xlu1 %2272 }
 0x70c   : > { %3239 = vlog2.f32 %v2273_v7  ;;  %v3230_v1 = vpop.eup %3229 }
 0x70d   : > { %3241 = vlog2.f32 %v2255_v24  ;;  %v2285_v35 = vmul.f32 0.6931472, %v3230_v1 }
 0x70f   : > { %v2261_v25 = vpop.xlane.xlu1 %2260  ;;  %v2271_v12 = vpop.xlane.xlu0 %2270  ;;  %v2315_v29 = vsub.f32 %v4297_v50, %v2285_v35 }
 0x710   : > { %3243 = vlog2.f32 %v2261_v25  ;;  %v3232_v38 = vpop.eup %3231 }
 0x711   : > { %3245 = vlog2.f32 %v2271_v12  ;;  %v3234_v13 = vpop.eup %3233  ;;  %2331 = vst [vmem:[#allocation15 + $0x8] sm:$0xff] %v2315_v29  ;;  %v2301_v15 = vmul.f32 0.6931472, %v3232_v38 }
 0x712   : > { %v2283_v40 = vmul.f32 0.6931472, %v3234_v13 }
 0x713   : > { %v2277_v17 = vpop.xlane.xlu1 %2276  ;;  %v2259_v57 = vpop.xlane.xlu0 %2258  ;;  %v2323_v43 = vsub.f32 %v4295_v21, %v2301_v15 }
 0x714   : > { %3247 = vlog2.f32 %v2277_v17  ;;  %v3236_v59 = vpop.eup %3235  ;;  %v2314_v9 = vsub.f32 %v4303_v54, %v2283_v40 }
 0x715   : > { %3249 = vlog2.f32 %v2259_v57  ;;  %v3238_v63 = vpop.eup %3237  ;;  %2339 = vst [vmem:[#allocation15 + $0x48] sm:$0xff] %v2323_v43  ;;  %v2289_v14 = vmul.f32 0.6931472, %v3236_v59 }
 0x716   : > { %2330 = vst [vmem:[#allocation15] sm:$0xff] %v2314_v9  ;;  %v2299_v50 = vmul.f32 0.6931472, %v3238_v63 }
 0x717   : > { %v2265_v60 = vpop.xlane.xlu1 %2264  ;;  %v2275_v42 = vpop.xlane.xlu0 %2274  ;;  %v2317_v19 = vsub.f32 %v4301_v6, %v2289_v14 }
 0x718   : > { %3251 = vlog2.f32 %v2265_v60  ;;  %v2322_v61 = vsub.f32 %v4307_v36, %v2299_v50 }
 0x719   : > { %v3240_v55 = vpop.eup %3239  ;;  %3253 = vlog2.f32 %v2275_v42  ;;  %2333 = vst [vmem:[#allocation15 + $0x18] sm:$0xff] %v2317_v19 }
 0x71a   : > { %v3242_v21 = vpop.eup %3241  ;;  %v2305_v26 = vmul.f32 0.6931472, %v3240_v55  ;;  %2338 = vst [vmem:[#allocation15 + $0x40] sm:$0xff] %v2322_v61 }
 0x71b   : > { %v2287_v54 = vmul.f32 0.6931472, %v3242_v21  ;;  %v2281_v30 = vpop.xlane.xlu1 %2280  ;;  %v2263_v34 = vpop.xlane.xlu0 %2262 }
 0x71c   : > { %v2325_v37 = vsub.f32 %v4309_v10, %v2305_v26  ;;  %3255 = vlog2.f32 %v2281_v30 }
 0x71d   : > { %v3244_v39 = vpop.eup %3243  ;;  %v2316_v33 = vsub.f32 %v4312_v11, %v2287_v54  ;;  %3257 = vlog2.f32 %v2263_v34 }
 0x71e   : > { %v3246_v6 = vpop.eup %3245  ;;  %2341 = vst [vmem:[#allocation15 + $0x58] sm:$0xff] %v2325_v37  ;;  %v2293_v41 = vmul.f32 0.6931472, %v3244_v39 }
 0x71f   : > { %2332 = vst [vmem:[#allocation15 + $0x10] sm:$0xff] %v2316_v33  ;;  %v2303_v36 = vmul.f32 0.6931472, %v3246_v6  ;;  %v2279_v53 = vpop.xlane.xlu0 %2278 }
 0x720   : > { %v2319_v44 = vsub.f32 %v4318_v48, %v2293_v41  ;;  %3259 = vlog2.f32 %v2279_v53 }
 0x721   : > { %v3248_v3 = vpop.eup %3247  ;;  %v2324_v58 = vsub.f32 %v4315_v47, %v2303_v36 }
 0x722   : > { %v3250_v8 = vpop.eup %3249  ;;  %2335 = vst [vmem:[#allocation15 + $0x28] sm:$0xff] %v2319_v44  ;;  %v2309_v10 = vmul.f32 0.6931472, %v3248_v3 }
 0x723   : > { %2340 = vst [vmem:[#allocation15 + $0x50] sm:$0xff] %v2324_v58  ;;  %v2291_v62 = vmul.f32 0.6931472, %v3250_v8 }
 0x724   : > { %v2327_v11 = vsub.f32 %v4324_v20, %v2309_v10 }
 0x725   : > { %v3252_v18 = vpop.eup %3251  ;;  %v2318_v4 = vsub.f32 %v4321_v32, %v2291_v62 }
 0x726   : > { %v3254_v5 = vpop.eup %3253  ;;  %2343 = vst [vmem:[#allocation15 + $0x68] sm:$0xff] %v2327_v11  ;;  %v2297_v45 = vmul.f32 0.6931472, %v3252_v18 }
 0x727   : > { %2334 = vst [vmem:[#allocation15 + $0x20] sm:$0xff] %v2318_v4  ;;  %v2307_v2 = vmul.f32 0.6931472, %v3254_v5 }
 0x728   : > { %v2321_v48 = vsub.f32 %v4331_v22, %v2297_v45 }
 0x729   : > { %v3256_v31 = vpop.eup %3255  ;;  %v2326_v47 = vsub.f32 %v4327_v56, %v2307_v2 }
 0x72a   : > { %v3258_v16 = vpop.eup %3257  ;;  %2337 = vst [vmem:[#allocation15 + $0x38] sm:$0xff] %v2321_v48  ;;  %v2313_v27 = vmul.f32 0.6931472, %v3256_v31 }
 0x72b   : > { %2342 = vst [vmem:[#allocation15 + $0x60] sm:$0xff] %v2326_v47  ;;  %v2295_v49 = vmul.f32 0.6931472, %v3258_v16 }
 0x72c   : > { %v2329_v20 = vsub.f32 %v4339_v46, %v2313_v27 }
 0x72d   : > { %v3260_v23 = vpop.eup %3259  ;;  %v2320_v32 = vsub.f32 %v4335_v28, %v2295_v49 }
 0x72e   : > { %2345 = vst [vmem:[#allocation15 + $0x78] sm:$0xff] %v2329_v20  ;;  %v2311_v51 = vmul.f32 0.6931472, %v3260_v23 }
 0x72f   : > { %2336 = vst [vmem:[#allocation15 + $0x30] sm:$0xff] %v2320_v32 }
 0x730   : > { %v2328_v52 = vsub.f32 %v4343_v0, %v2311_v51 }
 0x732   : > { %2344 = vst [vmem:[#allocation15 + $0x70] sm:$0xff] %v2328_v52 }
 0x733 PF: > { %p3022_p2 = scmp.eq.s32.totalorder %s3641_s14, 3  ;;  %s3547_s4 = smov [#allocation15]  }
 0x734   : > { %s2352_s21 = sshll.u32 %s3547_s4, 4  ;;  %s2353_s21 = int_to_ptr.vmem [resolvable:$true] %s2352_s21 }
 0x735   : > { %s3447_s13 = scalar_lea.vmem %s2353_s21, 2048  ;;  %p3454_p0 = scmp.lt.s32.totalorder %s2353_s21, %s2353_s21 }
 0x736   : > { %p3448_p10 = scmp.ne.s32.totalorder %s2353_s21, %s3447_s13  ;;  %p3455_p8 = scmp.lt.s32.totalorder %s3447_s13, %s3447_s13 }
 0x738   : > { %p3449_p12 = pnand %p3448_p10, %p3022_p2  ;;  %p3456_p1 = por %p3455_p8, %p3454_p0 }
 0x73a   : > { %p3450_p9 = pneg %p3449_p12 }
 0x73c   : > { %p3457_p3 = pnand %p3456_p1, %p3450_p9 }
 0x73e   : > { %3460 = shalt.err (!%p3457_p3)
}
 0x73f   : > { %s3548_s0 = smov 128   ;;  %s3549_s19 = smov 8  }
 0x740   : > { %s4482_s17 = sld [smem:[#allocation40_spill]] }
 0x746   : > { %2985 = dma.vmem_to_hbm [thread:$0]  (%p3022_p2), %s2353_s21, 2048, %s4482_s17, [#allocation6], %s3548_s0, %s3548_s0, %s3549_s19  }
 0x747   : > { %3516 = dma.done.wait (%p3022_p2), [#allocation6], 2048  }
 0x748   : > { %3518 = vsyncadd (%p3022_p2), [#allocation6], 4294965248 }
 0x749 PF: > { %s4483_s28 = sld [smem:[#allocation25_spill]]  ;;  %s4486_s25 = smov %s3525_s26 }
 0x74a   : > { %s4484_s27 = sld [smem:[#allocation24_spill]] }
 0x74b   : > { %s4485_s22 = sld [smem:[#allocation26_spill]] }
 0x74f   : > { %p24_p4 = scmp.ge.s32.totalorder %s4483_s28, 6  }
 0x750   : > { %s4487_s26 = smov %s4484_s27 }
 0x751   : > { %s4488_s27 = smov %s4485_s22  ;;  %26 = sbr.rel (!%p24_p4) target bundleno = 11 (0xb), region = 153 }
 0x756   :  { %2368 = vsyncpa [#allocation5], 1 }
 0x757   :  { %2370 = vsyncpa [#allocation5 + $0x1], 1 }
 0x758   :  { %2371 = vsyncpa [#allocation8], 1 }
 0x759   :  { %2372 = vsyncpa [#allocation12], 1 }
 0x75a   :  { %2373 = vsyncpa [#allocation6], 1 }
 0x75b   :  { %2375 = vsyncpa [#allocation6 + $0x1], 1 }

</bundles_post_ra>
